<compile_context>
chip_gen: v7x
topology: tpu7x:2x2x1
jax: 0.10.0
libtpu: 0.0.40
codegen_flags: <defaults>
</compile_context>

<pallas_src>
import functools

import jax
import jax.numpy as jnp
from jax import lax
from jax.experimental import pallas as pl
from jax.experimental.pallas import tpu as pltpu

INPUT_SIZE = 307
HIDDEN1 = 128
HIDDEN2 = 64
OUTPUT_SIZE = 1


def _round_up(n, m):
    return (n + m - 1) // m * m


def _siamese_kernel(x1_ref, x2_ref, w1_ref, b1_ref, w2_ref, b2_ref,
                    wf_ref, bf_ref, out_ref):
    cdt = w1_ref.dtype                                   # compute dtype (bf16/f32)

    # Raw f32 tiles -> compute dtype in-kernel (no wrapper cast pass, no K pad).
    x1 = x1_ref[...].astype(cdt)                         # (TB, 307)
    x2 = x2_ref[...].astype(cdt)                         # (TB, 307)

    w1 = w1_ref[...]                                     # (307, H1), VMEM resident
    b1 = b1_ref[...]                                     # (1, H1)   f32
    w2 = w2_ref[...]                                     # (H1, H2), VMEM resident
    b2 = b2_ref[...]                                     # (1, H2)   f32

    # Shared subnet, run per twin against the resident weights (no sublane
    # concat copy; MXU weight pushes are cheap relative to HBM input traffic).
    h1a = jnp.maximum(jnp.dot(x1, w1, preferred_element_type=jnp.float32) + b1, 0.0)
    h1b = jnp.maximum(jnp.dot(x2, w1, preferred_element_type=jnp.float32) + b1, 0.0)

    z1 = jnp.maximum(
        jnp.dot(h1a.astype(cdt), w2, preferred_element_type=jnp.float32) + b2, 0.0)
    z2 = jnp.maximum(
        jnp.dot(h1b.astype(cdt), w2, preferred_element_type=jnp.float32) + b2, 0.0)

    # Final linear layer without a lane-axis concat and without an N=1 matmul:
    #   score_j = wf[:H2] . z1_j + wf[H2:] . z2_j + bf
    # Minor-minor contraction yields a lane-dense (1, TB) row directly.
    wf1 = wf_ref[0:1, :].astype(jnp.float32)             # (1, H2)
    wf2 = wf_ref[1:2, :].astype(jnp.float32)             # (1, H2)
    dn = (((1,), (1,)), ((), ()))
    s = lax.dot_general(wf1, z1, dn, preferred_element_type=jnp.float32)
    s = s + lax.dot_general(wf2, z2, dn, preferred_element_type=jnp.float32)
    out_ref[...] = s + bf_ref[0, 0]                      # (1, TB)


def prepare_params(params, compute_dtype=jnp.bfloat16):
    """One-time glue (hoisted out of the forward): transpose weights to
    (in, out) and split wf into its two 64-wide halves. No K padding needed."""
    w1_t = jnp.asarray(params["w1"], jnp.float32).T                  # (307, H1)
    w2_t = jnp.asarray(params["w2"], jnp.float32).T                  # (H1, H2)
    wf2x = jnp.asarray(params["wf"], jnp.float32).reshape(2, HIDDEN2)
    return {
        "w1": w1_t.astype(compute_dtype),
        "b1": jnp.asarray(params["b1"], jnp.float32).reshape(1, HIDDEN1),
        "w2": w2_t.astype(compute_dtype),
        "b2": jnp.asarray(params["b2"], jnp.float32).reshape(1, HIDDEN2),
        "wf": wf2x,                                                  # f32 epilogue
        "bf": jnp.asarray(params["bf"], jnp.float32).reshape(1, 1),  # SMEM scalar
    }


def _pick_tile(B, block_b):
    """Batch tile (multiple of 16 sublanes).  Prefer the biggest tile <= block_b,
    but when one tile would cover the whole batch, split it in two (>=128 rows
    each) so a v7x chip can use both TensorCores on the 'parallel' grid axis."""
    full = _round_up(max(B, 1), 16)
    tb = min(block_b, full)
    if tb == full:
        half = _round_up(pl.cdiv(max(B, 1), 2), 16)
        if half >= 128:
            tb = half
    b_pad = _round_up(max(B, 1), tb)
    return tb, b_pad


@functools.partial(jax.jit, static_argnames=("block_b",))
def siamese_forward(x1, x2, prep, block_b=512):
    """x1, x2: (B, 307) f32.  prep: output of prepare_params.  Returns (B, 1)."""
    B = x1.shape[0]
    tb, b_pad = _pick_tile(B, block_b)
    num_tiles = b_pad // tb

    x1 = jnp.asarray(x1, jnp.float32)
    x2 = jnp.asarray(x2, jnp.float32)
    if b_pad > B:                                    # pad only when needed
        pad = ((0, b_pad - B), (0, 0))
        x1 = jnp.pad(x1, pad)
        x2 = jnp.pad(x2, pad)

    batch_map = lambda i: (i, 0)
    const_map = lambda i: (0, 0)

    out_row = pl.pallas_call(
        _siamese_kernel,
        out_shape=jax.ShapeDtypeStruct((1, b_pad), jnp.float32),
        grid=(num_tiles,),
        in_specs=[
            pl.BlockSpec((tb, INPUT_SIZE), batch_map),               # x1 tile (raw f32)
            pl.BlockSpec((tb, INPUT_SIZE), batch_map),               # x2 tile (raw f32)
            pl.BlockSpec((INPUT_SIZE, HIDDEN1), const_map),          # W1 resident
            pl.BlockSpec((1, HIDDEN1), const_map),                   # b1
            pl.BlockSpec((HIDDEN1, HIDDEN2), const_map),             # W2 resident
            pl.BlockSpec((1, HIDDEN2), const_map),                   # b2
            pl.BlockSpec((2, HIDDEN2), const_map),                   # wf halves
            pl.BlockSpec(memory_space=pltpu.MemorySpace.SMEM),       # bf scalar
        ],
        out_specs=pl.BlockSpec((1, tb), lambda i: (0, i)),           # lane-dense
        compiler_params=pltpu.CompilerParams(
            dimension_semantics=("parallel",),        # v7x: shard grid over 2 TCs
            vmem_limit_bytes=32 * 1024 * 1024,        # raise v5e's 16 MiB default
        ),
    )(x1, x2, prep["w1"], prep["b1"], prep["w2"], prep["b2"],
      prep["wf"], prep["bf"])

    return out_row[0, :B].reshape(B, OUTPUT_SIZE)


def reference_forward(x1, x2, params):
    def subnet(x):
        h = jnp.maximum(x @ params["w1"].T + params["b1"], 0.0)
        return jnp.maximum(h @ params["w2"].T + params["b2"], 0.0)
    c = jnp.concatenate([subnet(x1), subnet(x2)], axis=1)
    return c @ params["wf"].T + params["bf"]


def init_params(key):
    """Deterministic synthetic parameters (PyTorch nn.Linear shapes)."""
    ks = jax.random.split(key, 6)

    def u(k, shape, fan_in):
        bound = 1.0 / jnp.sqrt(fan_in)
        return jax.random.uniform(k, shape, jnp.float32, -bound, bound)

    return {
        "w1": u(ks[0], (HIDDEN1, INPUT_SIZE), INPUT_SIZE),
        "b1": u(ks[1], (HIDDEN1,), INPUT_SIZE),
        "w2": u(ks[2], (HIDDEN2, HIDDEN1), HIDDEN1),
        "b2": u(ks[3], (HIDDEN2,), HIDDEN1),
        "wf": u(ks[4], (OUTPUT_SIZE, HIDDEN2 * 2), HIDDEN2 * 2),
        "bf": u(ks[5], (OUTPUT_SIZE,), HIDDEN2 * 2),
    }


if __name__ == "__main__":
    key = jax.random.PRNGKey(0)
    k_p, k_x1, k_x2 = jax.random.split(key, 3)

    params = init_params(k_p)
    B = 256                          # -> two 128-row tiles (dual-TC path on v7x)
    x1 = jax.random.normal(k_x1, (B, INPUT_SIZE), jnp.float32)
    x2 = jax.random.normal(k_x2, (B, INPUT_SIZE), jnp.float32)

    ref = reference_forward(x1, x2, params)

    # f32 operands: strict correctness check.
    prep_f32 = prepare_params(params, jnp.float32)
    out_f32 = jax.block_until_ready(siamese_forward(x1, x2, prep_f32))
    assert out_f32.shape == (B, OUTPUT_SIZE)
    assert jnp.allclose(out_f32, ref, atol=1e-4, rtol=1e-4), (out_f32[:4], ref[:4])

    # bf16 operands (f32 accumulation + f32 epilogue): mem-bound fast path.
    prep_bf16 = prepare_params(params, jnp.bfloat16)
    out_bf16 = jax.block_until_ready(siamese_forward(x1, x2, prep_bf16))
    assert out_bf16.shape == (B, OUTPUT_SIZE)
    assert jnp.allclose(out_bf16, ref, atol=5e-2, rtol=5e-2), (out_bf16[:4], ref[:4])

    # Small-batch single-tile path (exercises batch padding).
    out_small = jax.block_until_ready(siamese_forward(x1[:8], x2[:8], prep_f32))
    assert jnp.allclose(out_small, ref[:8], atol=1e-4, rtol=1e-4)

    # Non-multiple batch (single odd-sized tile, padded rows sliced off).
    out_odd = jax.block_until_ready(siamese_forward(x1[:200], x2[:200], prep_f32))
    assert jnp.allclose(out_odd, ref[:200], atol=1e-4, rtol=1e-4)

    print("KERNEL_OK")
</pallas_src>

<mosaic_0001>
module attributes {stable_mosaic.version = 11 : i64} {
  func.func @_siamese_kernel(%arg0: i32, %arg1: memref<128x307xf32, #tpu.memory_space<vmem>>, %arg2: memref<128x307xf32, #tpu.memory_space<vmem>>, %arg3: memref<307x128xf32, #tpu.memory_space<vmem>>, %arg4: memref<1x128xf32, #tpu.memory_space<vmem>>, %arg5: memref<128x64xf32, #tpu.memory_space<vmem>>, %arg6: memref<1x64xf32, #tpu.memory_space<vmem>>, %arg7: memref<2x64xf32, #tpu.memory_space<vmem>>, %arg8: memref<1x1xf32, #tpu.memory_space<smem>>, %arg9: memref<1x128xf32, #tpu.memory_space<vmem>>) attributes {dimension_semantics = [#tpu.dimension_semantics<parallel>], iteration_bounds = array<i64: 2>, scalar_prefetch = 0 : i64, scratch_operands = 0 : i64, tpu.core_type = #tpu.core_type<tc>, window_params = [{transform_indices = @transform_0, window_bounds = array<i64: 128, 307>}, {transform_indices = @transform_1, window_bounds = array<i64: 128, 307>}, {pipeline_mode = #tpu.pipeline_mode<synchronous>, transform_indices = @transform_2, window_bounds = array<i64: 307, 128>}, {pipeline_mode = #tpu.pipeline_mode<synchronous>, transform_indices = @transform_3, window_bounds = array<i64: 1, 128>}, {pipeline_mode = #tpu.pipeline_mode<synchronous>, transform_indices = @transform_4, window_bounds = array<i64: 128, 64>}, {pipeline_mode = #tpu.pipeline_mode<synchronous>, transform_indices = @transform_5, window_bounds = array<i64: 1, 64>}, {pipeline_mode = #tpu.pipeline_mode<synchronous>, transform_indices = @transform_6, window_bounds = array<i64: 2, 64>}, {transform_indices = @transform_7, window_bounds = array<i64: 1, 1>}, {transform_indices = @transform_8, window_bounds = array<i64: 1, 128>}]} {
    %c0 = arith.constant 0 : index
    %c0_0 = arith.constant 0 : index
    %0 = vector.load %arg1[%c0, %c0_0] : memref<128x307xf32, #tpu.memory_space<vmem>>, vector<128x307xf32>
    %c0_1 = arith.constant 0 : index
    %c0_2 = arith.constant 0 : index
    %1 = vector.load %arg2[%c0_1, %c0_2] : memref<128x307xf32, #tpu.memory_space<vmem>>, vector<128x307xf32>
    %c0_3 = arith.constant 0 : index
    %c0_4 = arith.constant 0 : index
    %2 = vector.load %arg3[%c0_3, %c0_4] : memref<307x128xf32, #tpu.memory_space<vmem>>, vector<307x128xf32>
    %c0_5 = arith.constant 0 : index
    %c0_6 = arith.constant 0 : index
    %3 = vector.load %arg4[%c0_5, %c0_6] : memref<1x128xf32, #tpu.memory_space<vmem>>, vector<1x128xf32>
    %c0_7 = arith.constant 0 : index
    %c0_8 = arith.constant 0 : index
    %4 = vector.load %arg5[%c0_7, %c0_8] : memref<128x64xf32, #tpu.memory_space<vmem>>, vector<128x64xf32>
    %c0_9 = arith.constant 0 : index
    %c0_10 = arith.constant 0 : index
    %5 = vector.load %arg6[%c0_9, %c0_10] : memref<1x64xf32, #tpu.memory_space<vmem>>, vector<1x64xf32>
    %cst = arith.constant dense<0.000000e+00> : vector<128x128xf32>
    %6 = tpu.matmul %0, %2, %cst {dimension_numbers = #tpu.dot_dimension_numbers<[1], [0], [0], [1], [0, 0, 1, 1], [], []>} : vector<128x307xf32>, vector<307x128xf32>, vector<128x128xf32> -> vector<128x128xf32>
    %7 = vector.broadcast %3 : vector<1x128xf32> to vector<128x128xf32>
    %8 = arith.addf %6, %7 : vector<128x128xf32>
    %cst_11 = arith.constant 0.000000e+00 : f32
    %9 = vector.broadcast %cst_11 : f32 to vector<128x128xf32>
    %10 = arith.maximumf %8, %9 : vector<128x128xf32>
    %cst_12 = arith.constant dense<0.000000e+00> : vector<128x128xf32>
    %11 = tpu.matmul %1, %2, %cst_12 {dimension_numbers = #tpu.dot_dimension_numbers<[1], [0], [0], [1], [0, 0, 1, 1], [], []>} : vector<128x307xf32>, vector<307x128xf32>, vector<128x128xf32> -> vector<128x128xf32>
    %12 = vector.broadcast %3 : vector<1x128xf32> to vector<128x128xf32>
    %13 = arith.addf %11, %12 : vector<128x128xf32>
    %cst_13 = arith.constant 0.000000e+00 : f32
    %14 = vector.broadcast %cst_13 : f32 to vector<128x128xf32>
    %15 = arith.maximumf %13, %14 : vector<128x128xf32>
    %cst_14 = arith.constant dense<0.000000e+00> : vector<128x64xf32>
    %16 = tpu.matmul %10, %4, %cst_14 {dimension_numbers = #tpu.dot_dimension_numbers<[1], [0], [0], [1], [0, 0, 1, 1], [], []>} : vector<128x128xf32>, vector<128x64xf32>, vector<128x64xf32> -> vector<128x64xf32>
    %17 = vector.broadcast %5 : vector<1x64xf32> to vector<128x64xf32>
    %18 = arith.addf %16, %17 : vector<128x64xf32>
    %cst_15 = arith.constant 0.000000e+00 : f32
    %19 = vector.broadcast %cst_15 : f32 to vector<128x64xf32>
    %20 = arith.maximumf %18, %19 : vector<128x64xf32>
    %cst_16 = arith.constant dense<0.000000e+00> : vector<128x64xf32>
    %21 = tpu.matmul %15, %4, %cst_16 {dimension_numbers = #tpu.dot_dimension_numbers<[1], [0], [0], [1], [0, 0, 1, 1], [], []>} : vector<128x128xf32>, vector<128x64xf32>, vector<128x64xf32> -> vector<128x64xf32>
    %22 = vector.broadcast %5 : vector<1x64xf32> to vector<128x64xf32>
    %23 = arith.addf %21, %22 : vector<128x64xf32>
    %cst_17 = arith.constant 0.000000e+00 : f32
    %24 = vector.broadcast %cst_17 : f32 to vector<128x64xf32>
    %25 = arith.maximumf %23, %24 : vector<128x64xf32>
    %c0_18 = arith.constant 0 : index
    %c0_19 = arith.constant 0 : index
    %26 = vector.load %arg7[%c0_18, %c0_19] : memref<2x64xf32, #tpu.memory_space<vmem>>, vector<1x64xf32>
    %c1 = arith.constant 1 : index
    %c0_20 = arith.constant 0 : index
    %27 = vector.load %arg7[%c1, %c0_20] : memref<2x64xf32, #tpu.memory_space<vmem>>, vector<1x64xf32>
    %cst_21 = arith.constant dense<0.000000e+00> : vector<1x128xf32>
    %28 = tpu.matmul %26, %20, %cst_21 {dimension_numbers = #tpu.dot_dimension_numbers<[1], [1], [0], [0], [0, 0, 1, 0], [], []>} : vector<1x64xf32>, vector<128x64xf32>, vector<1x128xf32> -> vector<1x128xf32>
    %cst_22 = arith.constant dense<0.000000e+00> : vector<1x128xf32>
    %29 = tpu.matmul %27, %25, %cst_22 {dimension_numbers = #tpu.dot_dimension_numbers<[1], [1], [0], [0], [0, 0, 1, 0], [], []>} : vector<1x64xf32>, vector<128x64xf32>, vector<1x128xf32> -> vector<1x128xf32>
    %30 = arith.addf %28, %29 : vector<1x128xf32>
    %c0_23 = arith.constant 0 : index
    %c0_24 = arith.constant 0 : index
    %31 = memref.load %arg8[%c0_23, %c0_24] : memref<1x1xf32, #tpu.memory_space<smem>>
    %32 = vector.broadcast %31 : f32 to vector<1x128xf32>
    %33 = arith.addf %30, %32 : vector<1x128xf32>
    %c0_25 = arith.constant 0 : index
    %c0_26 = arith.constant 0 : index
    %34 = vector.load %arg9[%c0_25, %c0_26] : memref<1x128xf32, #tpu.memory_space<vmem>>, vector<1x128xf32>
    tpu.vector_store %arg9[%c0_25, %c0_26], %33 {strides = array<i32>} : memref<1x128xf32, #tpu.memory_space<vmem>>, vector<1x128xf32>,
    return
  }
  func.func @transform_0(%arg0: i32) -> (i32, i32) {
    %c0_i32 = arith.constant 0 : i32
    %c0_i32_0 = arith.constant 0 : i32
    return %arg0, %c0_i32 : i32, i32
  }
  func.func @transform_1(%arg0: i32) -> (i32, i32) {
    %c0_i32 = arith.constant 0 : i32
    %c0_i32_0 = arith.constant 0 : i32
    return %arg0, %c0_i32 : i32, i32
  }
  func.func @transform_2(%arg0: i32) -> (i32, i32) {
    %c0_i32 = arith.constant 0 : i32
    %c0_i32_0 = arith.constant 0 : i32
    %c0_i32_1 = arith.constant 0 : i32
    return %c0_i32, %c0_i32_0 : i32, i32
  }
  func.func @transform_3(%arg0: i32) -> (i32, i32) {
    %c0_i32 = arith.constant 0 : i32
    %c0_i32_0 = arith.constant 0 : i32
    %c0_i32_1 = arith.constant 0 : i32
    return %c0_i32, %c0_i32_0 : i32, i32
  }
  func.func @transform_4(%arg0: i32) -> (i32, i32) {
    %c0_i32 = arith.constant 0 : i32
    %c0_i32_0 = arith.constant 0 : i32
    %c0_i32_1 = arith.constant 0 : i32
    return %c0_i32, %c0_i32_0 : i32, i32
  }
  func.func @transform_5(%arg0: i32) -> (i32, i32) {
    %c0_i32 = arith.constant 0 : i32
    %c0_i32_0 = arith.constant 0 : i32
    %c0_i32_1 = arith.constant 0 : i32
    return %c0_i32, %c0_i32_0 : i32, i32
  }
  func.func @transform_6(%arg0: i32) -> (i32, i32) {
    %c0_i32 = arith.constant 0 : i32
    %c0_i32_0 = arith.constant 0 : i32
    %c0_i32_1 = arith.constant 0 : i32
    return %c0_i32, %c0_i32_0 : i32, i32
  }
  func.func @transform_7(%arg0: i32) -> (i32, i32) {
    %c0_i32 = arith.constant 0 : i32
    %c0_i32_0 = arith.constant 0 : i32
    %c0_i32_1 = arith.constant 0 : i32
    return %c0_i32, %c0_i32_0 : i32, i32
  }
  func.func @transform_8(%arg0: i32) -> (i32, i32) {
    %c0_i32 = arith.constant 0 : i32
    %c0_i32_0 = arith.constant 0 : i32
    return %c0_i32, %arg0 : i32, i32
  }
}

</mosaic_0001>

<bundles_post_ra>
// kernel: siamese_forward.1
= control target key start
LH: loop header
LB: loop body
LE: loop exit
PB: predicated region body
PF: predicated region fallthrough
CT: control target
= control target key end

     0   :  { %s3596_s0 = inlined_call_operand.vmem [shape: f32[256,307], index: 0, kind: input, shape index: {}]   ;;  %s3597_s1 = inlined_call_operand.vmem [shape: f32[256,307], index: 1, kind: input, shape index: {}]   ;;  %s3598_s2 = inlined_call_operand.vmem [shape: f32[307,128], index: 2, kind: input, shape index: {}]   ;;  %s3599_s3 = inlined_call_operand.vmem [shape: f32[1,128], index: 3, kind: input, shape index: {}]   ;;  %s3600_s4 = inlined_call_operand.vmem [shape: f32[128,64], index: 4, kind: input, shape index: {}]   ;;  %s3601_s5 = inlined_call_operand.vmem [shape: f32[1,64], index: 5, kind: input, shape index: {}]   ;;  %s3602_s6 = inlined_call_operand.vmem [shape: f32[2,64], index: 6, kind: input, shape index: {}]   ;;  %s3603_s7 = inlined_call_operand.<no memory space> [shape: f32[1,1], index: 7, kind: input, shape index: {}]   ;;  %s3604_s8 = inlined_call_operand.hbm [shape: f32[1,256], index: 8, kind: output, shape index: {}]  }
   0x1   :  { %13 = sst [smem:[#allocation2]] %s3603_s7 }
   0x2   :  { %14 = vsyncpa [#allocation4], 0 }
   0x3   :  { %16 = vsyncpa [#allocation4 + $0x1], 0  ;;  %s2881_s29 = smov 0   ;;  %s2883_s30 = smov 0  }
   0x4   :  { %s2885_s9 = smov 0   ;;  %s2887_s10 = smov 0  }
   0x5 LB: > { %s1862_s7 = sadd.s32 4294967295, %s2827_s10   ;;  %s1863_s11 = sadd.s32 4294967294, %s2827_s10   ;;  %s2827_s10 = sphi %s2887_s10, %s3612_s10   ;;  %s2823_s9 = sphi %s2885_s9, %s3611_s9   ;;  %s2819_s30 = sphi %s2883_s30, %s3610_s30   ;;  %s2815_s29 = sphi %s2881_s29, %s3609_s29  }
   0x6   : > { %s2904_s12 = sadd.s32 1, %s2827_s10   ;;  %s207_s13 = sadd.s32 1, %s2823_s9 }
   0x7   : > { %s204_s14 = ssub.s32 %s2827_s10, %s2904_s12  ;;  %p217_p0 = scmp.ne.s32.totalorder %s2823_s9, %s2819_s30 }
   0x8   : > { %p205_p1 = scmp.eq.s32.totalorder %s204_s14, 0  ;;  %p218_p2 = scmp.eq.s32.totalorder %s1862_s7, 1 }
   0x9   : > { %p223_p3 = scmp.ne.s32.totalorder %s2819_s30, %s2815_s29  ;;  %p224_p4 = scmp.eq.s32.totalorder %s1863_s11, 1 }
   0xa   : > { %s2914_s15 = scalar_select %p205_p1, %s2823_s9, %s207_s13  }
   0xb   : > { %p2916_p5 = por %p218_p2, %p217_p0  ;;  %p2920_p6 = por %p224_p4, %p223_p3 }
   0xc   : > { %p1866_p7 = scmp.ge.s32.totalorder %s2827_s10, 1  ;;  %p280_p8 = scmp.lt.s32.totalorder %s2827_s10, 3 }
   0xe   : > { %p281_p9 = pnand %p1866_p7, %p280_p8 }
   0xf   : > { %v446_v0 = vld [vmem:[%s3598_s2 + $0x80] sm:$0xff] (!%p281_p9)  ;;  %v447_v1 = vld [vmem:[%s3598_s2 + $0x88] sm:$0xff] (!%p281_p9)  ;;  %s2935_s24 = sshll.u32 (!%p281_p9), %s1862_s7, 4  ;;  %v448_v5 = vld [vmem:[%s3598_s2 + $0x90] sm:$0xff] (!%p281_p9)  ;;  %vm493_vm0 = vcmask (!%p281_p9), 416768   ;;  %vm542_vm1 = vcmask (!%p281_p9), 1042432  }
  0x10   : > { %284 = sbr.rel (%p281_p9) target bundleno = 844 (0x34c), region = 52  ;;  %v430_v2 = vld [vmem:[%s3598_s2] sm:$0xff] (!%p281_p9)  ;;  %v2937_v3 = vpack.c.bf16 (!%p281_p9), %v447_v1, %v446_v0  ;;  %v431_v4 = vld [vmem:[%s3598_s2 + $0x8] sm:$0xff] (!%p281_p9)  ;;  %v449_v6 = vld [vmem:[%s3598_s2 + $0x98] sm:$0xff] (!%p281_p9)  ;;  %p321_p10 = scmp.lt.s32.totalorder (!%p281_p9), %s2935_s24, 31  ;;  %vm2830_vm2 = vmmov (!%p281_p9), 0  }
  0x11   : > { %v2949_v7 = vpack.c.bf16 (!%p281_p9), %v431_v4, %v430_v2  ;;  %v2951_v8 = vpack.c.bf16 (!%p281_p9), %v449_v6, %v448_v5  ;;  %v432_v9 = vld [vmem:[%s3598_s2 + $0x10] sm:$0xff] (!%p281_p9)  ;;  %v433_v10 = vld [vmem:[%s3598_s2 + $0x18] sm:$0xff] (!%p281_p9)  ;;  %v450_v11 = vld [vmem:[%s3598_s2 + $0xa0] sm:$0xff] (!%p281_p9)  ;;  %vm1536_vm3 = vcmask (!%p281_p9), 523264   ;;  %s1779_s19 = sld [smem:[#allocation2]] (!%p281_p9)  ;;  %s318_s21 = sand.u32 (!%p281_p9), 1, %s2819_s30  }
  0x12   : > { %2507 = vmatprep.subr.bf16.mxu0 (!%p281_p9), %v2937_v3  ;;  %v451_v12 = vld [vmem:[%s3598_s2 + $0xa8] sm:$0xff] (!%p281_p9)  ;;  %v2970_v13 = vpack.c.bf16 (!%p281_p9), %v433_v10, %v432_v9  ;;  %v434_v15 = vld [vmem:[%s3598_s2 + $0x20] sm:$0xff] (!%p281_p9)  ;;  %v452_v17 = vld [vmem:[%s3598_s2 + $0xb0] sm:$0xff] (!%p281_p9)  ;;  %s319_s22 = scalar_lea.vmem (!%p281_p9), [#allocation3], %s318_s21  ;;  %s1784_s27 = scalar_lea.sflag (!%p281_p9), [#allocation4], %s318_s21 }
  0x13   : > { %2509 = vmatpush3.bf16.msra.mxu0 (!%p281_p9), %v2949_v7  ;;  %v2973_v14 = vpack.c.bf16 (!%p281_p9), %v451_v12, %v450_v11  ;;  %v435_v16 = vld [vmem:[%s3598_s2 + $0x28] sm:$0xff] (!%p281_p9)  ;;  %v453_v18 = vld [vmem:[%s3598_s2 + $0xb8] sm:$0xff] (!%p281_p9)  ;;  %v462_v20 = vld [vmem:[%s3598_s2 + $0x100] sm:$0xff] (!%p281_p9)  ;;  %s2832_s28 = smov (!%p281_p9), [#allocation3]  }
  0x14   : > { %2511 = vmatprep.subr.bf16.mxu0 (!%p281_p9), %v2951_v8  ;;  %v2989_v19 = vpack.c.bf16 (!%p281_p9), %v435_v16, %v434_v15  ;;  %v463_v21 = vld [vmem:[%s3598_s2 + $0x108] sm:$0xff] (!%p281_p9)  ;;  %v2998_v22 = vpack.c.bf16 (!%p281_p9), %v453_v18, %v452_v17  ;;  %v436_v23 = vld [vmem:[%s3598_s2 + $0x30] sm:$0xff] (!%p281_p9)  ;;  %v437_v24 = vld [vmem:[%s3598_s2 + $0x38] sm:$0xff] (!%p281_p9)  ;;  %s2769_s11 = sshll.u32 (!%p281_p9), %s2832_s28, 4  ;;  %s2770_s11 = int_to_ptr.vmem [resolvable:$false] %s2769_s11 }
  0x15   : > { %v454_v25 = vld [vmem:[%s3598_s2 + $0xc0] sm:$0xff] (!%p281_p9)  ;;  %v3009_v26 = vpack.c.bf16 (!%p281_p9), %v463_v21, %v462_v20  ;;  %v455_v27 = vld [vmem:[%s3598_s2 + $0xc8] sm:$0xff] (!%p281_p9)  ;;  %v464_v28 = vld [vmem:[%s3598_s2 + $0x110] sm:$0xff] (!%p281_p9)  ;;  %v3031_v31 = vpack.c.bf16 (!%p281_p9), %v437_v24, %v436_v23  ;;  %s2771_s7 = scalar_lea.vmem (!%p281_p9), %s2770_s11, 32 }
  0x16   : > { %v465_v29 = vld [vmem:[%s3598_s2 + $0x118] sm:$0xff] (!%p281_p9)  ;;  %v466_v32 = vld [vmem:[%s3598_s2 + $0x120] sm:$0xff] (!%p281_p9)  ;;  %v467_v33 = vld [vmem:[%s3598_s2 + $0x128] sm:$0xff] (!%p281_p9)  ;;  %v3042_v35 = vpack.c.bf16 (!%p281_p9), %v455_v27, %v454_v25 }
  0x17   : > { %s2967_s25 = scalar_select %p321_p10, %s2935_s24, 31  ;;  %2513 = vmatpush3.bf16.msra.mxu0 %v2970_v13  ;;  %2539 = vmatprep.subr.bf16.mxu1 %v3009_v26  ;;  %v3028_v30 = vpack.c.bf16 %v465_v29, %v464_v28  ;;  %v438_v36 = vld [vmem:[%s3598_s2 + $0x40] sm:$0xff]  ;;  %v439_v37 = vld [vmem:[%s3598_s2 + $0x48] sm:$0xff]  ;;  %v3051_v38 = vpack.c.bf16 %v467_v33, %v466_v32  ;;  %v456_v39 = vld [vmem:[%s3598_s2 + $0xd0] sm:$0xff] }
  0x18   : > { %2515 = vmatprep.subr.bf16.mxu0 %v2973_v14  ;;  %2541 = vmatpush3.bf16.msra.mxu1 %v3009_v26  ;;  %v457_v40 = vld [vmem:[%s3598_s2 + $0xd8] sm:$0xff]  ;;  %v3062_v42 = vpack.c.bf16 %v439_v37, %v438_v36  ;;  %v440_v44 = vld [vmem:[%s3598_s2 + $0x50] sm:$0xff]  ;;  %v458_v46 = vld [vmem:[%s3598_s2 + $0xe0] sm:$0xff] }
  0x19   : > { %s2722_s13 = smul.u32 24, %s2967_s25  ;;  %2543 = vmatprep.subr.bf16.mxu1 %v3028_v30  ;;  %v3066_v43 = vpack.c.bf16 %v457_v40, %v456_v39  ;;  %v441_v45 = vld [vmem:[%s3598_s2 + $0x58] sm:$0xff]  ;;  %v459_v47 = vld [vmem:[%s3598_s2 + $0xe8] sm:$0xff]  ;;  %v3084_v48 = vld [vmem:[%s3598_s2 + $0x130] sm:$0x7]  ;;  %s1796_s25 = sshll.u32 %s319_s22, 4  ;;  %s3556_s25 = int_to_ptr.vmem [resolvable:$true] %s1796_s25 }
  0x1a   : > { %v3087_v49 = vpack.c.bf16 %v441_v45, %v440_v44  ;;  %v3091_v50 = vpack.c.bf16 %v459_v47, %v458_v46  ;;  %v442_v51 = vld [vmem:[%s3598_s2 + $0x60] sm:$0xff]  ;;  %v443_v52 = vld [vmem:[%s3598_s2 + $0x68] sm:$0xff]  ;;  %v460_v53 = vld [vmem:[%s3598_s2 + $0xf0] sm:$0xff]  ;;  %p2772_p0 = scmp.lt.s32.totalorder %s3556_s25, %s2770_s11 }
  0x1b   : > { %s3016_s20 = scalar_lea.vmem %s3596_s0, %s2722_s13  ;;  %2517 = vmatpush3.bf16.msra.mxu0 %v2989_v19  ;;  %v461_v54 = vld [vmem:[%s3598_s2 + $0xf8] sm:$0xff]  ;;  %v3110_v57 = vpack.c.bf16 %v443_v52, %v442_v51  ;;  %v444_v59 = vld [vmem:[%s3598_s2 + $0x70] sm:$0xff]  ;;  %v470_v16 = vld [vmem:[%s3600_s4] sm:$0xff]  ;;  %s3193_s23 = scalar_lea.vmem %s3597_s1, %s2722_s13 }
  0x1c   : > { %v335_v34 = vld [vmem:[%s3016_s20 + $0x8] sm:$0xff]  ;;  %2519 = vmatprep.subr.bf16.mxu0 %v2998_v22  ;;  %v336_v41 = vld [vmem:[%s3016_s20 + $0x10] sm:$0xff]  ;;  %2545 = vmatpush3.bf16.msra.mxu1 %v3028_v30  ;;  %v342_v56 = vld [vmem:[%s3016_s20 + $0x40] sm:$0xff]  ;;  %v3115_v58 = vpack.c.bf16 %v461_v54, %v460_v53 }
  0x1d   : > { %610 = vmatprep.mubr.f32.mxu0 %v335_v34  ;;  %2262 = vmatprep.mubr.msk.f32.mxu1 %vm493_vm0, %v336_v41  ;;  %v339_v55 = vld [vmem:[%s3016_s20 + $0x28] sm:$0xff]  ;;  %v445_v60 = vld [vmem:[%s3598_s2 + $0x78] sm:$0xff]  ;;  %v348_v62 = vld [vmem:[%s3016_s20 + $0x70] sm:$0xff] }
  0x1e   : > { %2547 = vmatprep.subr.bf16.mxu1 %v3051_v38  ;;  %v345_v61 = vld [vmem:[%s3016_s20 + $0x58] sm:$0xff]  ;;  %v3130_v63 = vpack.c.bf16 %v445_v60, %v444_v59  ;;  %v351_v0 = vld [vmem:[%s3016_s20 + $0x88] sm:$0xff]  ;;  %v354_v1 = vld [vmem:[%s3016_s20 + $0xa0] sm:$0xff] }
  0x1f   : > { %2521 = vmatpush3.bf16.msra.mxu0 %v3031_v31  ;;  %v334_v2 = vld [vmem:[%s3016_s20] sm:$0xff]  ;;  %v357_v4 = vld [vmem:[%s3016_s20 + $0xb8] sm:$0xff]  ;;  %v360_v5 = vld [vmem:[%s3016_s20 + $0xd0] sm:$0xff] }
  0x20   : > { %2523 = vmatprep.subr.bf16.mxu0 %v3042_v35  ;;  %2549 = vmatpush3.bf16.msra.mxu1 %v3051_v38  ;;  %v337_v6 = vld [vmem:[%s3016_s20 + $0x18] sm:$0xff]  ;;  %v366_v9 = vld [vmem:[%s3016_s20 + $0x100] sm:$0xff]  ;;  %v340_v10 = vld [vmem:[%s3016_s20 + $0x30] sm:$0xff] }
  0x21   : > { %2260 = vmatprep.subr.msk.mxu1 %vm542_vm1, %v3084_v48  ;;  %v344_v11 = vld [vmem:[%s3016_s20 + $0x50] sm:$0xff]  ;;  %v369_v12 = vld [vmem:[%s3016_s20 + $0x118] sm:$0xff]  ;;  %v347_v15 = vld [vmem:[%s3016_s20 + $0x68] sm:$0xff] }
  0x22   : > { %v471_v17 = vld [vmem:[%s3600_s4 + $0x8] sm:$0xff]  ;;  %v346_v20 = vld [vmem:[%s3016_s20 + $0x60] sm:$0xff]  ;;  %v381_v23 = vld [vmem:[%s3016_s20 + $0x178] sm:$0xff] }
  0x23   : > { %2525 = vmatpush3.bf16.msra.mxu0 %v3062_v42  ;;  %v375_v18 = vld [vmem:[%s3016_s20 + $0x148] sm:$0xff]  ;;  %v3195_v21 = vpack.c.bf16 %v471_v17, %v470_v16  ;;  %v349_v25 = vld [vmem:[%s3016_s20 + $0x78] sm:$0xff]  ;;  %v472_v27 = vld [vmem:[%s3600_s4 + $0x10] sm:$0xff] }
  0x24   : > { %2527 = vmatprep.subr.bf16.mxu0 %v3066_v43  ;;  %2261 = vmatpush3.msk.msra.mxu1 %vm542_vm1, %v3084_v48  ;;  %v383_v24 = vld [vmem:[%s3193_s23 + $0x8] sm:$0xff]  ;;  %v473_v28 = vld [vmem:[%s3600_s4 + $0x18] sm:$0xff]  ;;  %v382_v29 = vld [vmem:[%s3193_s23] sm:$0xff] }
  0x25   : > { %2263 = vmatmul.mubr.msk.f32.vlgmr.msra.gmra.mrb[0].mxu1 %vm493_vm0, %v339_v55  ;;  %2551 = vmatprep.subr.bf16.mxu1 %v2937_v3  ;;  %v338_v3 = vld [vmem:[%s3016_s20 + $0x20] sm:$0xff]  ;;  %v356_v32 = vld [vmem:[%s3016_s20 + $0xb0] sm:$0xff]  ;;  %v3222_v33 = vpack.c.bf16 %v473_v28, %v472_v27  ;;  %v385_v36 = vld [vmem:[%s3193_s23 + $0x18] sm:$0xff] }
  0x26   : > { %2265 = vmatprep.mubr.msk.f32.mxu1 %vm493_vm0, %v342_v56  ;;  %2553 = vmatpush3.bf16.msra.mxu1 %v2949_v7  ;;  %v341_v7 = vld [vmem:[%s3016_s20 + $0x38] sm:$0xff]  ;;  %v474_v34 = vld [vmem:[%s3600_s4 + $0x20] sm:$0xff]  ;;  %v355_v37 = vld [vmem:[%s3016_s20 + $0xa8] sm:$0xff] }
  0x27   : > { %2529 = vmatpush3.bf16.msra.mxu0 %v3087_v49  ;;  %2555 = vmatprep.subr.bf16.mxu1 %v2951_v8  ;;  %v363_v8 = vld [vmem:[%s3016_s20 + $0xe8] sm:$0xff]  ;;  %v476_v41 = vld [vmem:[%s3600_s4 + $0x30] sm:$0xff]  ;;  %v358_v44 = vld [vmem:[%s3016_s20 + $0xc0] sm:$0xff] }
  0x28   : > { %2531 = vmatprep.subr.bf16.mxu0 %v3091_v50  ;;  %v359_v39 = vld [vmem:[%s3016_s20 + $0xc8] sm:$0xff]  ;;  %v392_v45 = vld [vmem:[%s3193_s23 + $0x50] sm:$0xff]  ;;  %v362_v46 = vld [vmem:[%s3016_s20 + $0xe0] sm:$0xff] }
  0x29   : > { %2266 = vmatmul.mubr.msk.f32.gmra.mrb[2].mxu1 %vm493_vm0, %v345_v61  ;;  %v361_v51 = vld [vmem:[%s3016_s20 + $0xd8] sm:$0xff]  ;;  %v395_v52 = vld [vmem:[%s3193_s23 + $0x68] sm:$0xff]  ;;  %v394_v55 = vld [vmem:[%s3193_s23 + $0x60] sm:$0xff] }
  0x2a   : > { %2268 = vmatprep.mubr.msk.f32.mxu1 %vm493_vm0, %v348_v62  ;;  %2557 = vmatpush3.bf16.msra.mxu1 %v2970_v13  ;;  %v372_v13 = vld [vmem:[%s3016_s20 + $0x130] sm:$0xff]  ;;  %v365_v53 = vld [vmem:[%s3016_s20 + $0xf8] sm:$0xff]  ;;  %v367_v60 = vld [vmem:[%s3016_s20 + $0x108] sm:$0xff] }
  0x2b   : > { %2533 = vmatpush3.bf16.msra.mxu0 %v3110_v57  ;;  %2559 = vmatprep.subr.bf16.mxu1 %v2973_v14  ;;  %v343_v14 = vld [vmem:[%s3016_s20 + $0x48] sm:$0xff]  ;;  %v364_v56 = vld [vmem:[%s3016_s20 + $0xf0] sm:$0xff]  ;;  %v397_v59 = vld [vmem:[%s3193_s23 + $0x78] sm:$0xff] }
  0x2c   : > { %2535 = vmatprep.subr.bf16.mxu0 %v3115_v58  ;;  %v401_v61 = vld [vmem:[%s3193_s23 + $0x98] sm:$0xff]  ;;  %v371_v62 = vld [vmem:[%s3016_s20 + $0x128] sm:$0xff]  ;;  %v416_v17 = vld [vmem:[%s3193_s23 + $0x110] sm:$0xff] }
  0x2d   : > { %2269 = vmatmul.mubr.msk.f32.gmra.mrb[4].mxu1 %vm493_vm0, %v351_v0  ;;  %v370_v0 = vld [vmem:[%s3016_s20 + $0x120] sm:$0xff]  ;;  %v387_v16 = vld [vmem:[%s3193_s23 + $0x28] sm:$0xff]  ;;  %v421_v27 = vld [vmem:[%s3193_s23 + $0x138] sm:$0xff] }
  0x2e   : > { %2271 = vmatprep.mubr.msk.f32.mxu1 %vm493_vm0, %v354_v1  ;;  %2561 = vmatpush3.bf16.msra.mxu1 %v2989_v19  ;;  %v378_v19 = vld [vmem:[%s3016_s20 + $0x160] sm:$0xff]  ;;  %v404_v1 = vld [vmem:[%s3193_s23 + $0xb0] sm:$0xff]  ;;  %v405_v28 = vld [vmem:[%s3193_s23 + $0xb8] sm:$0xff] }
  0x2f   : > { %2537 = vmatpush3.bf16.msra.mxu0 %v3130_v63  ;;  %2563 = vmatprep.subr.bf16.mxu1 %v2998_v22  ;;  %v350_v22 = vld [vmem:[%s3016_s20 + $0x80] sm:$0xff]  ;;  %vm3461_vm4 = vmpackc.low %vm1536_vm3, %vm1536_vm3 }
  0x30   : > { %2583 = vmatprep.subr.bf16.mxu0 %v3009_v26 }
  0x31   : > { %2272 = vmatmul.mubr.msk.f32.gmra.mrb[6].mxu1 %vm493_vm0, %v357_v4  ;;  %v373_v4 = vld [vmem:[%s3016_s20 + $0x138] sm:$0xff] }
  0x32   : > { %611 = vmatmul.mubr.f32.vlgmr.msra.gmra.mrb[0].mxu0 %v334_v2  ;;  %2274 = vmatprep.mubr.msk.f32.mxu1 %vm493_vm0, %v360_v5  ;;  %v374_v2 = vld [vmem:[%s3016_s20 + $0x140] sm:$0xff]  ;;  %v407_v5 = vld [vmem:[%s3193_s23 + $0xc8] sm:$0xff] }
  0x33   : > { %2585 = vmatpush3.bf16.msra.mxu0 %v3009_v26  ;;  %615 = vmatprep.mubr.f32.mxu0 %v338_v3  ;;  %v353_v26 = vld [vmem:[%s3016_s20 + $0x98] sm:$0xff]  ;;  %v403_v3 = vld [vmem:[%s3193_s23 + $0xa8] sm:$0xff] }
  0x34   : > { %2587 = vmatprep.subr.bf16.mxu0 %v3028_v30  ;;  %2565 = vmatpush3.bf16.msra.mxu1 %v3031_v31  ;;  %v386_v31 = vld [vmem:[%s3193_s23 + $0x20] sm:$0xff] }
  0x35   : > { %2275 = vmatmul.mubr.msk.f32.gmra.mrb[8].mxu1 %vm493_vm0, %v363_v8  ;;  %2567 = vmatprep.subr.bf16.mxu1 %v3042_v35  ;;  %v475_v35 = vld [vmem:[%s3600_s4 + $0x28] sm:$0xff]  ;;  %v376_v8 = vld [vmem:[%s3016_s20 + $0x150] sm:$0xff] }
  0x36   : > { %616 = vmatmul.mubr.f32.gmra.mrb[2].mxu0 %v337_v6  ;;  %2277 = vmatprep.mubr.msk.f32.mxu1 %vm493_vm0, %v366_v9  ;;  %v3236_v40 = vpack.c.bf16 %v475_v35, %v474_v34  ;;  %v377_v6 = vld [vmem:[%s3016_s20 + $0x158] sm:$0xff]  ;;  %v410_v9 = vld [vmem:[%s3193_s23 + $0xe0] sm:$0xff]  ;;  %v427_v35 = vld [vmem:[%s3193_s23 + $0x168] sm:$0xff] }
  0x37   : > { %620 = vmatprep.mubr.f32.mxu0 %v341_v7  ;;  %2589 = vmatpush3.bf16.msra.mxu0 %v3028_v30  ;;  %v352_v30 = vld [vmem:[%s3016_s20 + $0x90] sm:$0xff]  ;;  %v406_v7 = vld [vmem:[%s3193_s23 + $0xc0] sm:$0xff] }
  0x38   : > { %2591 = vmatprep.subr.bf16.mxu0 %v3051_v38  ;;  %2569 = vmatpush3.bf16.msra.mxu1 %v3062_v42  ;;  %v477_v42 = vld [vmem:[%s3600_s4 + $0x38] sm:$0xff]  ;;  %v414_v34 = vld [vmem:[%s3193_s23 + $0x100] sm:$0xff] }
  0x39   : > { %2278 = vmatmul.mubr.msk.f32.gmra.mrb[10].mxu1 %vm493_vm0, %v369_v12  ;;  %2571 = vmatprep.subr.bf16.mxu1 %v3066_v43  ;;  %v388_v43 = vld [vmem:[%s3193_s23 + $0x30] sm:$0xff]  ;;  %v3250_v47 = vpack.c.bf16 %v477_v42, %v476_v41  ;;  %v379_v12 = vld [vmem:[%s3016_s20 + $0x168] sm:$0xff]  ;;  %v426_v42 = vld [vmem:[%s3193_s23 + $0x160] sm:$0xff] }
  0x3a   : > { %621 = vmatmul.mubr.f32.gmra.mrb[4].mxu0 %v340_v10  ;;  %2280 = vmatprep.mubr.msk.f32.mxu1 %vm493_vm0, %v372_v13  ;;  %v380_v10 = vld [vmem:[%s3016_s20 + $0x170] sm:$0xff]  ;;  %v413_v13 = vld [vmem:[%s3193_s23 + $0xf8] sm:$0xff]  ;;  %v423_v41 = vld [vmem:[%s3193_s23 + $0x148] sm:$0xff] }
  0x3b   : > { %625 = vmatprep.mubr.f32.mxu0 %v344_v11  ;;  %2593 = vmatpush3.bf16.msra.mxu0 %v3051_v38  ;;  %v389_v38 = vld [vmem:[%s3193_s23 + $0x38] sm:$0xff] }
  0x3c   : > { %2298 = vmatprep.subr.msk.mxu0 %vm542_vm1, %v3084_v48  ;;  %2573 = vmatpush3.bf16.msra.mxu1 %v3087_v49  ;;  %v479_v49 = vld [vmem:[%s3600_s4 + $0x48] sm:$0xff]  ;;  %v409_v11 = vld [vmem:[%s3193_s23 + $0xd8] sm:$0xff] }
  0x3d   : > { %2575 = vmatprep.subr.bf16.mxu1 %v3091_v50  ;;  %2281 = vmatmul.mubr.msk.f32.gmra.mrb[12].mxu1 %vm493_vm0, %v375_v18  ;;  %v391_v50 = vld [vmem:[%s3193_s23 + $0x48] sm:$0xff]  ;;  %v390_v18 = vld [vmem:[%s3193_s23 + $0x40] sm:$0xff] }
  0x3e   : > { %626 = vmatmul.mubr.f32.gmra.mrb[6].mxu0 %v343_v14  ;;  %2283 = vmatprep.mubr.msk.f32.mxu1 %vm493_vm0, %v378_v19  ;;  %v384_v14 = vld [vmem:[%s3193_s23 + $0x10] sm:$0xff]  ;;  %v415_v19 = vld [vmem:[%s3193_s23 + $0x108] sm:$0xff] }
  0x3f   : > { %630 = vmatprep.mubr.f32.mxu0 %v347_v15  ;;  %2299 = vmatpush3.msk.msra.mxu0 %vm542_vm1, %v3084_v48  ;;  %v478_v48 = vld [vmem:[%s3600_s4 + $0x40] sm:$0xff]  ;;  %v412_v15 = vld [vmem:[%s3193_s23 + $0xf0] sm:$0xff] }
  0x40   : > { %2627 = vmatprep.subr.bf16.mxu0 %v3195_v21  ;;  %2577 = vmatpush3.bf16.msra.mxu1 %v3110_v57  ;;  %v3264_v54 = vpack.c.bf16 %v479_v49, %v478_v48  ;;  %v398_v57 = vld [vmem:[%s3193_s23 + $0x80] sm:$0xff]  ;;  %v485_v48 = vld [vmem:[%s3600_s4 + $0x78] sm:$0xff] }
  0x41   : > { %2579 = vmatprep.subr.bf16.mxu1 %v3115_v58  ;;  %2284 = vmatmul.mubr.msk.f32.gmra.mrb[14].mxu1 %vm493_vm0, %v381_v23  ;;  %v368_v58 = vld [vmem:[%s3016_s20 + $0x110] sm:$0xff]  ;;  %s2765_s20 = scalar_lea.vmem %s3556_s25, 16 }
  0x42   : > { %631 = vmatmul.mubr.f32.gmra.mrb[8].mxu0 %v346_v20  ;;  %964 = vmatprep.mubr.f32.mxu1 %v383_v24  ;;  %v393_v20 = vld [vmem:[%s3193_s23 + $0x58] sm:$0xff]  ;;  %v396_v23 = vld [vmem:[%s3193_s23 + $0x70] sm:$0xff]  ;;  %v418_v24 = vld [vmem:[%s3193_s23 + $0x120] sm:$0xff]  ;;  %p2766_p11 = scmp.ne.s32.totalorder %s3556_s25, %s2765_s20  ;;  %p2773_p1 = scmp.lt.s32.totalorder %s2771_s7, %s2765_s20 }
  0x43   : > { %635 = vmatprep.mubr.f32.mxu0 %v350_v22  ;;  %v419_v22 = vld [vmem:[%s3193_s23 + $0x128] sm:$0xff] }
  0x44   : > { %2581 = vmatpush3.bf16.msra.mxu1 %v3130_v63  ;;  %v400_v63 = vld [vmem:[%s3193_s23 + $0x90] sm:$0xff]  ;;  %p2767_p12 = pnand %p2766_p11, %p2916_p5  ;;  %p2774_p2 = por %p2773_p1, %p2772_p0 }
  0x45   : > { %2595 = vmatprep.subr.bf16.mxu1 %v3195_v21 }
  0x46   : > { %636 = vmatmul.mubr.f32.gmra.mrb[10].mxu0 %v349_v25  ;;  %v399_v25 = vld [vmem:[%s3193_s23 + $0x88] sm:$0xff]  ;;  %p2768_p13 = pneg %p2767_p12 }
  0x47   : > { %640 = vmatprep.mubr.f32.mxu0 %v353_v26  ;;  %965 = vmatmul.mubr.f32.vlgmr.msra.gmra.mrb[16].mxu1 %v382_v29  ;;  %v422_v26 = vld [vmem:[%s3193_s23 + $0x140] sm:$0xff]  ;;  %v425_v29 = vld [vmem:[%s3193_s23 + $0x158] sm:$0xff] }
  0x48   : > { %969 = vmatprep.mubr.f32.mxu1 %v386_v31  ;;  %2597 = vmatpush3.bf16.msra.mxu1 %v3195_v21  ;;  %v424_v31 = vld [vmem:[%s3193_s23 + $0x150] sm:$0xff]  ;;  %p2775_p3 = pnand %p2774_p2, %p2768_p13 }
  0x49   : > { %2599 = vmatprep.subr.bf16.mxu1 %v3222_v33 }
  0x4a   : > { %641 = vmatmul.mubr.f32.gmra.mrb[12].mxu0 %v352_v30  ;;  %v408_v30 = vld [vmem:[%s3193_s23 + $0xd0] sm:$0xff] }
  0x4b   : > { %645 = vmatprep.mubr.f32.mxu0 %v356_v32  ;;  %970 = vmatmul.mubr.f32.gmra.mrb[18].mxu1 %v385_v36  ;;  %v411_v32 = vld [vmem:[%s3193_s23 + $0xe8] sm:$0xff]  ;;  %v417_v36 = vld [vmem:[%s3193_s23 + $0x118] sm:$0xff] }
  0x4c   : > { %974 = vmatprep.mubr.f32.mxu1 %v389_v38  ;;  %2601 = vmatpush3.bf16.msra.mxu1 %v3222_v33  ;;  %v480_v38 = vld [vmem:[%s3600_s4 + $0x50] sm:$0xff] }
  0x4d   : > { %2603 = vmatprep.subr.bf16.mxu1 %v3236_v40 }
  0x4e   : > { %646 = vmatmul.mubr.f32.gmra.mrb[14].mxu0 %v355_v37  ;;  %v420_v37 = vld [vmem:[%s3193_s23 + $0x130] sm:$0xff] }
  0x4f   : > { %650 = vmatprep.mubr.f32.mxu0 %v359_v39  ;;  %975 = vmatmul.mubr.f32.gmra.mrb[20].mxu1 %v388_v43  ;;  %v481_v39 = vld [vmem:[%s3600_s4 + $0x58] sm:$0xff]  ;;  %v482_v43 = vld [vmem:[%s3600_s4 + $0x60] sm:$0xff] }
  0x50   : > { %979 = vmatprep.mubr.f32.mxu1 %v392_v45  ;;  %2605 = vmatpush3.bf16.msra.mxu1 %v3236_v40 }
  0x51   : > { %2607 = vmatprep.subr.bf16.mxu1 %v3250_v47 }
  0x52   : > { %651 = vmatmul.mubr.f32.gmra.mrb[16].mxu0 %v358_v44  ;;  %v483_v44 = vld [vmem:[%s3600_s4 + $0x68] sm:$0xff] }
  0x53   : > { %655 = vmatprep.mubr.f32.mxu0 %v362_v46  ;;  %980 = vmatmul.mubr.f32.gmra.mrb[22].mxu1 %v391_v50  ;;  %v2618_v45 = vpack.c.bf16 %v483_v44, %v482_v43  ;;  %v429_v46 = vld [vmem:[%s3193_s23 + $0x178] sm:$0xff] }
  0x54   : > { %984 = vmatprep.mubr.f32.mxu1 %v395_v52  ;;  %2609 = vmatpush3.bf16.msra.mxu1 %v3250_v47 }
  0x55   : > { %2611 = vmatprep.subr.bf16.mxu1 %v3264_v54 }
  0x56   : > { %656 = vmatmul.mubr.f32.gmra.mrb[18].mxu0 %v361_v51 }
  0x57   : > { %660 = vmatprep.mubr.f32.mxu0 %v365_v53  ;;  %985 = vmatmul.mubr.f32.gmra.mrb[24].mxu1 %v394_v55 }
  0x58   : > { %989 = vmatprep.mubr.f32.mxu1 %v398_v57  ;;  %2613 = vmatpush3.bf16.msra.mxu1 %v3264_v54 }
  0x5a   : > { %661 = vmatmul.mubr.f32.gmra.mrb[20].mxu0 %v364_v56 }
  0x5b   : > { %665 = vmatprep.mubr.f32.mxu0 %v368_v58  ;;  %990 = vmatmul.mubr.f32.gmra.mrb[26].mxu1 %v397_v59  ;;  %v3365_v58 = vld [vmem:[%s3599_s3] ss:$0 sm:$0xff] }
  0x5c   : > { %994 = vmatprep.mubr.f32.mxu1 %v401_v61 }
  0x5e   : > { %666 = vmatmul.mubr.f32.gmra.mrb[22].mxu0 %v367_v60 }
  0x5f   : > { %670 = vmatprep.mubr.f32.mxu0 %v371_v62  ;;  %995 = vmatmul.mubr.f32.gmra.mrb[28].mxu1 %v400_v63 }
  0x60   : > { %999 = vmatprep.mubr.f32.mxu1 %v404_v1 }
  0x62   : > { %671 = vmatmul.mubr.f32.gmra.mrb[24].mxu0 %v370_v0 }
  0x63   : > { %675 = vmatprep.mubr.f32.mxu0 %v374_v2  ;;  %1000 = vmatmul.mubr.f32.gmra.mrb[30].mxu1 %v403_v3 }
  0x64   : > { %1004 = vmatprep.mubr.f32.mxu1 %v407_v5 }
  0x66   : > { %676 = vmatmul.mubr.f32.gmra.mrb[26].mxu0 %v373_v4 }
  0x67   : > { %680 = vmatprep.mubr.f32.mxu0 %v377_v6  ;;  %1005 = vmatmul.mubr.f32.gmra.mrb[32].mxu1 %v406_v7 }
  0x68   : > { %1009 = vmatprep.mubr.f32.mxu1 %v410_v9 }
  0x6a   : > { %681 = vmatmul.mubr.f32.gmra.mrb[28].mxu0 %v376_v8 }
  0x6b   : > { %685 = vmatprep.mubr.f32.mxu0 %v380_v10  ;;  %1010 = vmatmul.mubr.f32.gmra.mrb[34].mxu1 %v409_v11 }
  0x6c   : > { %1014 = vmatprep.mubr.f32.mxu1 %v413_v13 }
  0x6e   : > { %686 = vmatmul.mubr.f32.gmra.mrb[30].mxu0 %v379_v12 }
  0x6f   : > { %2300 = vmatprep.mubr.msk.f32.mxu0 %vm493_vm0, %v384_v14  ;;  %1015 = vmatmul.mubr.f32.gmra.mrb[36].mxu1 %v412_v15 }
  0x70   : > { %1019 = vmatprep.mubr.f32.mxu1 %v416_v17 }
  0x72   : > { %2301 = vmatmul.mubr.msk.f32.vlgmr.msra.gmra.mrb[32].mxu0 %vm493_vm0, %v387_v16 }
  0x73   : > { %2303 = vmatprep.mubr.msk.f32.mxu0 %vm493_vm0, %v390_v18  ;;  %2629 = vmatpush3.bf16.msra.mxu0 %v3195_v21  ;;  %v402_v21 = vld [vmem:[%s3193_s23 + $0xa0] sm:$0xff] }
  0x74   : > { %2631 = vmatprep.subr.bf16.mxu0 %v3222_v33  ;;  %1020 = vmatmul.mubr.f32.gmra.mrb[38].mxu1 %v415_v19 }
  0x75   : > { %1024 = vmatprep.mubr.f32.mxu1 %v419_v22 }
  0x76   : > { %2304 = vmatmul.mubr.msk.f32.gmra.mrb[34].mxu0 %vm493_vm0, %v393_v20 }
  0x77   : > { %2306 = vmatprep.mubr.msk.f32.mxu0 %vm493_vm0, %v396_v23  ;;  %2633 = vmatpush3.bf16.msra.mxu0 %v3222_v33  ;;  %v428_v33 = vld [vmem:[%s3193_s23 + $0x170] sm:$0xff]  ;;  %s3554_s23 = scalar_lea.hbm %s3604_s8, %s2935_s24 }
  0x78   : > { %2635 = vmatprep.subr.bf16.mxu0 %v3236_v40  ;;  %1025 = vmatmul.mubr.f32.gmra.mrb[40].mxu1 %v418_v24 }
  0x79   : > { %1029 = vmatprep.mubr.f32.mxu1 %v422_v26 }
  0x7a   : > { %2307 = vmatmul.mubr.msk.f32.gmra.mrb[36].mxu0 %vm493_vm0, %v399_v25 }
  0x7b   : > { %2309 = vmatprep.mubr.msk.f32.mxu0 %vm493_vm0, %v402_v21  ;;  %2637 = vmatpush3.bf16.msra.mxu0 %v3236_v40  ;;  %v2614_v40 = vpack.c.bf16 %v481_v39, %v480_v38 }
  0x7c   : > { %2639 = vmatprep.subr.bf16.mxu0 %v3250_v47  ;;  %1030 = vmatmul.mubr.f32.gmra.mrb[42].mxu1 %v421_v27 }
  0x7d   : > { %1034 = vmatprep.mubr.f32.mxu1 %v425_v29  ;;  %2615 = vmatprep.subr.bf16.mxu1 %v2614_v40 }
  0x7e   : > { %2310 = vmatmul.mubr.msk.f32.gmra.mrb[38].mxu0 %vm493_vm0, %v405_v28  ;;  %2617 = vmatpush3.bf16.msra.mxu1 %v2614_v40 }
  0x7f   : > { %2312 = vmatprep.mubr.msk.f32.mxu0 %vm493_vm0, %v408_v30  ;;  %2641 = vmatpush3.bf16.msra.mxu0 %v3250_v47  ;;  %v484_v47 = vld [vmem:[%s3600_s4 + $0x70] sm:$0xff] }
  0x80   : > { %2643 = vmatprep.subr.bf16.mxu0 %v3264_v54  ;;  %1035 = vmatmul.mubr.f32.gmra.mrb[44].mxu1 %v424_v31  ;;  %v2622_v49 = vpack.c.bf16 %v485_v48, %v484_v47 }
  0x81   : > { %1039 = vmatprep.mubr.f32.mxu1 %v428_v33  ;;  %2619 = vmatprep.subr.bf16.mxu1 %v2618_v45 }
  0x82   : > { %2313 = vmatmul.mubr.msk.f32.gmra.mrb[40].mxu0 %vm493_vm0, %v411_v32  ;;  %2621 = vmatpush3.bf16.msra.mxu1 %v2618_v45 }
  0x83   : > { %2315 = vmatprep.mubr.msk.f32.mxu0 %vm493_vm0, %v414_v34  ;;  %2645 = vmatpush3.bf16.msra.mxu0 %v3264_v54 }
  0x84   : > { %1040 = vmatmul.mubr.f32.gmra.mrb[46].mxu1 %v427_v35  ;;  %2647 = vmatprep.subr.bf16.mxu0 %v2614_v40 }
  0x85   : > { %2623 = vmatprep.subr.bf16.mxu1 %v2622_v49 }
  0x86   : > { %2316 = vmatmul.mubr.msk.f32.gmra.mrb[42].mxu0 %vm493_vm0, %v417_v36  ;;  %2625 = vmatpush3.bf16.msra.mxu1 %v2622_v49 }
  0x87   : > { %2318 = vmatprep.mubr.msk.f32.mxu0 %vm493_vm0, %v420_v37  ;;  %2649 = vmatpush3.bf16.msra.mxu0 %v2614_v40 }
  0x88   : > { %2651 = vmatprep.subr.bf16.mxu0 %v2618_v45 }
  0x8a   : > { %2319 = vmatmul.mubr.msk.f32.gmra.mrb[44].mxu0 %vm493_vm0, %v423_v41 }
  0x8b   : > { %2321 = vmatprep.mubr.msk.f32.mxu0 %vm493_vm0, %v426_v42  ;;  %2653 = vmatpush3.bf16.msra.mxu0 %v2618_v45 }
  0x8c   : > { %2655 = vmatprep.subr.bf16.mxu0 %v2622_v49 }
  0x8e   : > { %2322 = vmatmul.mubr.msk.f32.gmra.mrb[46].mxu0 %vm493_vm0, %v429_v46 }
  0x8f   : > { %2657 = vmatpush3.bf16.msra.mxu0 %v2622_v49 }
  0xf8   : > { %v2264_v50 = vpop.f32.mrb[0].mxu1 }
  0xf9   : > { %v757_v51 = vpop.f32.mrb[1].mxu1 }
  0xfc   : > { %v2267_v52 = vpop.f32.mrb[2].mxu1 }
  0xfd   : > { %v767_v53 = vpop.f32.mrb[3].mxu1 }
 0x100   : > { %v2270_v54 = vpop.f32.mrb[4].mxu1 }
 0x101   : > { %v777_v55 = vpop.f32.mrb[5].mxu1 }
 0x104   : > { %v3367_v60 = vpop.f32.mrb[6].mxu1 }
 0x105   : > { %v1976_v56 = vpop.f32.mrb[0].mxu0  ;;  %v787_v61 = vpop.f32.mrb[7].mxu1 }
 0x106   : > { %v1977_v57 = vpop.f32.mrb[1].mxu0 }
 0x107   : > { %v1978_v59 = vadd.f32 %v1977_v57, %v1976_v56 }
 0x108   : > { %v3370_v3 = vpop.f32.mrb[8].mxu1 }
 0x109   : > { %v1979_v62 = vpop.f32.mrb[2].mxu0  ;;  %v613_v63 = vadd.f32 %v1978_v59, %v3365_v58  ;;  %v3372_v4 = vpop.f32.mrb[9].mxu1 }
 0x10a   : > { %v1980_v0 = vpop.f32.mrb[3].mxu0 }
 0x10b   : > { %v1981_v1 = vadd.f32 %v1980_v0, %v1979_v62  ;;  %v758_v2 = vadd.f32 %v757_v51, %v613_v63 }
 0x10c   : > { %v3375_v11 = vpop.f32.mrb[10].mxu1 }
 0x10d   : > { %v618_v5 = vadd.f32 %v1981_v1, %v3365_v58  ;;  %v836_v6 = vmax.f32 %v758_v2, 0.0  ;;  %v1982_v7 = vpop.f32.mrb[4].mxu0  ;;  %v3377_v12 = vpop.f32.mrb[11].mxu1 }
 0x10e   : > { %v1983_v8 = vpop.f32.mrb[5].mxu0 }
 0x10f   : > { %v763_v9 = vadd.f32 %v2264_v50, %v618_v5  ;;  %v1984_v10 = vadd.f32 %v1983_v8, %v1982_v7  ;;  %2356 = vmatprep.mubr.f32.mxu1 %v836_v6 }
 0x110   : > { %v3380_v19 = vpop.f32.mrb[12].mxu1 }
 0x111   : > { %v837_v13 = vmax.f32 %v763_v9, 0.0  ;;  %v1985_v14 = vpop.f32.mrb[6].mxu0  ;;  %v623_v15 = vadd.f32 %v1984_v10, %v3365_v58  ;;  %v3382_v20 = vpop.f32.mrb[13].mxu1 }
 0x112   : > { %v1986_v16 = vpop.f32.mrb[7].mxu0 }
 0x113   : > { %v1987_v17 = vadd.f32 %v1986_v16, %v1985_v14  ;;  %v768_v18 = vadd.f32 %v767_v53, %v623_v15  ;;  %2357 = vmatmul.mubr.f32.vlgmr.msra.gmra.mrb[48].mxu1 %v837_v13 }
 0x114   : > { %v3385_v27 = vpop.f32.mrb[14].mxu1 }
 0x115   : > { %v628_v22 = vadd.f32 %v1987_v17, %v3365_v58  ;;  %v838_v23 = vmax.f32 %v768_v18, 0.0  ;;  %v1988_v24 = vpop.f32.mrb[8].mxu0  ;;  %v3387_v28 = vpop.f32.mrb[15].mxu1 }
 0x116   : > { %v1989_v25 = vpop.f32.mrb[9].mxu0 }
 0x117   : > { %v1990_v26 = vadd.f32 %v1989_v25, %v1988_v24  ;;  %2359 = vmatprep.mubr.f32.mxu1 %v838_v23  ;;  %v773_v21 = vadd.f32 %v2267_v52, %v628_v22 }
 0x119   : > { %v1991_v29 = vpop.f32.mrb[10].mxu0  ;;  %v633_v30 = vadd.f32 %v1990_v26, %v3365_v58  ;;  %v839_v31 = vmax.f32 %v773_v21, 0.0 }
 0x11a   : > { %v1992_v32 = vpop.f32.mrb[11].mxu0  ;;  %v2079_v35 = vpop.f32.mrb[16].mxu1 }
 0x11b   : > { %v1993_v33 = vadd.f32 %v1992_v32, %v1991_v29  ;;  %v778_v34 = vadd.f32 %v777_v55, %v633_v30  ;;  %2360 = vmatmul.mubr.f32.gmra.mrb[50].mxu1 %v839_v31  ;;  %v2080_v39 = vpop.f32.mrb[17].mxu1 }
 0x11c   : > { %v3391_v41 = vadd.f32 %v2080_v39, %v2079_v35 }
 0x11d   : > { %v638_v36 = vadd.f32 %v1993_v33, %v3365_v58  ;;  %v840_v37 = vmax.f32 %v778_v34, 0.0  ;;  %v1994_v38 = vpop.f32.mrb[12].mxu0 }
 0x11e   : > { %v1995_v40 = vpop.f32.mrb[13].mxu0  ;;  %v2082_v44 = vpop.f32.mrb[18].mxu1 }
 0x11f   : > { %v1996_v42 = vadd.f32 %v1995_v40, %v1994_v38  ;;  %2362 = vmatprep.mubr.f32.mxu1 %v840_v37  ;;  %v783_v43 = vadd.f32 %v2270_v54, %v638_v36  ;;  %v2083_v48 = vpop.f32.mrb[19].mxu1 }
 0x120   : > { %v3394_v50 = vadd.f32 %v2083_v48, %v2082_v44 }
 0x121   : > { %v1997_v45 = vpop.f32.mrb[14].mxu0  ;;  %v643_v46 = vadd.f32 %v1996_v42, %v3365_v58  ;;  %v841_v47 = vmax.f32 %v783_v43, 0.0 }
 0x122   : > { %v1998_v49 = vpop.f32.mrb[15].mxu0  ;;  %v2085_v53 = vpop.f32.mrb[20].mxu1 }
 0x123   : > { %v1999_v51 = vadd.f32 %v1998_v49, %v1997_v45  ;;  %v788_v52 = vadd.f32 %v787_v61, %v643_v46  ;;  %2363 = vmatmul.mubr.f32.gmra.mrb[52].mxu1 %v841_v47  ;;  %v2086_v59 = vpop.f32.mrb[21].mxu1 }
 0x124   : > { %v3397_v54 = vadd.f32 %v2086_v59, %v2085_v53 }
 0x125   : > { %v648_v55 = vadd.f32 %v1999_v51, %v3365_v58  ;;  %v842_v56 = vmax.f32 %v788_v52, 0.0  ;;  %v2000_v57 = vpop.f32.mrb[16].mxu0 }
 0x126   : > { %v2001_v62 = vpop.f32.mrb[17].mxu0  ;;  %v2088_v1 = vpop.f32.mrb[22].mxu1 }
 0x127   : > { %v2002_v63 = vadd.f32 %v2001_v62, %v2000_v57  ;;  %2365 = vmatprep.mubr.f32.mxu1 %v842_v56  ;;  %v793_v0 = vadd.f32 %v3367_v60, %v648_v55  ;;  %v2089_v61 = vpop.f32.mrb[23].mxu1 }
 0x128   : > { %v3401_v8 = vadd.f32 %v2089_v61, %v2088_v1 }
 0x129   : > { %v2003_v2 = vpop.f32.mrb[18].mxu0  ;;  %v653_v5 = vadd.f32 %v2002_v63, %v3365_v58  ;;  %v843_v6 = vmax.f32 %v793_v0, 0.0 }
 0x12a   : > { %v2004_v7 = vpop.f32.mrb[19].mxu0  ;;  %v2091_v13 = vpop.f32.mrb[24].mxu1 }
 0x12b   : > { %v2005_v9 = vadd.f32 %v2004_v7, %v2003_v2  ;;  %v798_v10 = vadd.f32 %v3372_v4, %v653_v5  ;;  %2366 = vmatmul.mubr.f32.gmra.mrb[54].mxu1 %v843_v6  ;;  %v2092_v17 = vpop.f32.mrb[25].mxu1  ;;  %v972_v6 = vadd.f32 %v3394_v50, %v3365_v58 }
 0x12c   : > { %v3405_v18 = vadd.f32 %v2092_v17, %v2091_v13 }
 0x12d   : > { %v658_v14 = vadd.f32 %v2005_v9, %v3365_v58  ;;  %v844_v15 = vmax.f32 %v798_v10, 0.0  ;;  %v2006_v16 = vpop.f32.mrb[20].mxu0 }
 0x12e   : > { %v2007_v60 = vpop.f32.mrb[21].mxu0  ;;  %v2094_v24 = vpop.f32.mrb[26].mxu1 }
 0x12f   : > { %v2008_v22 = vadd.f32 %v2007_v60, %v2006_v16  ;;  %2368 = vmatprep.mubr.f32.mxu1 %v844_v15  ;;  %v803_v23 = vadd.f32 %v3370_v3, %v658_v14  ;;  %v2095_v4 = vpop.f32.mrb[27].mxu1 }
 0x130   : > { %v3409_v30 = vadd.f32 %v2095_v4, %v2094_v24 }
 0x131   : > { %v2009_v25 = vpop.f32.mrb[22].mxu0  ;;  %v663_v26 = vadd.f32 %v2008_v22, %v3365_v58  ;;  %v845_v21 = vmax.f32 %v803_v23, 0.0  ;;  %v982_v22 = vadd.f32 %v3401_v8, %v3365_v58 }
 0x132   : > { %v2010_v29 = vpop.f32.mrb[23].mxu0  ;;  %v2097_v33 = vpop.f32.mrb[28].mxu1 }
 0x133   : > { %v2011_v31 = vadd.f32 %v2010_v29, %v2009_v25  ;;  %v808_v32 = vadd.f32 %v3377_v12, %v663_v26  ;;  %2369 = vmatmul.mubr.f32.gmra.mrb[56].mxu1 %v845_v21  ;;  %v2098_v37 = vpop.f32.mrb[29].mxu1 }
 0x134   : > { %v3413_v38 = vadd.f32 %v2098_v37, %v2097_v33  ;;  %v992_v33 = vadd.f32 %v3409_v30, %v3365_v58 }
 0x135   : > { %v668_v34 = vadd.f32 %v2011_v31, %v3365_v58  ;;  %v846_v35 = vmax.f32 %v808_v32, 0.0  ;;  %v2012_v36 = vpop.f32.mrb[24].mxu0 }
 0x136   : > { %v2013_v3 = vpop.f32.mrb[25].mxu0  ;;  %v2100_v42 = vpop.f32.mrb[30].mxu1 }
 0x137   : > { %v2014_v39 = vadd.f32 %v2013_v3, %v2012_v36  ;;  %2371 = vmatprep.mubr.f32.mxu1 %v846_v35  ;;  %v813_v40 = vadd.f32 %v3375_v11, %v668_v34  ;;  %v2101_v12 = vpop.f32.mrb[31].mxu1 }
 0x138   : > { %v2102_v47 = vadd.f32 %v2101_v12, %v2100_v42 }
 0x139   : > { %v673_v43 = vadd.f32 %v2014_v39, %v3365_v58  ;;  %v2015_v44 = vpop.f32.mrb[26].mxu0  ;;  %v847_v45 = vmax.f32 %v813_v40, 0.0 }
 0x13a   : > { %v2016_v46 = vpop.f32.mrb[27].mxu0  ;;  %v2103_v51 = vpop.f32.mrb[32].mxu1  ;;  %v1002_v42 = vadd.f32 %v2102_v47, %v3365_v58 }
 0x13b   : > { %v818_v48 = vadd.f32 %v3382_v20, %v673_v43  ;;  %v2017_v49 = vadd.f32 %v2016_v46, %v2015_v44  ;;  %2372 = vmatmul.mubr.f32.gmra.mrb[58].mxu1 %v847_v45  ;;  %v2104_v56 = vpop.f32.mrb[33].mxu1  ;;  %v997_v44 = vadd.f32 %v3413_v38, %v3365_v58 }
 0x13c   : > { %v3419_v11 = vadd.f32 %v2104_v56, %v2103_v51 }
 0x13d   : > { %v848_v52 = vmax.f32 %v818_v48, 0.0  ;;  %v678_v53 = vadd.f32 %v2017_v49, %v3365_v58  ;;  %v2018_v55 = vpop.f32.mrb[28].mxu0 }
 0x13e   : > { %v2019_v57 = vpop.f32.mrb[29].mxu0  ;;  %v2106_v63 = vpop.f32.mrb[34].mxu1  ;;  %v1007_v47 = vadd.f32 %v3419_v11, %v3365_v58 }
 0x13f   : > { %v2020_v59 = vadd.f32 %v2019_v57, %v2018_v55  ;;  %2374 = vmatprep.mubr.f32.mxu1 %v848_v52  ;;  %v823_v62 = vadd.f32 %v3380_v19, %v678_v53  ;;  %v2107_v2 = vpop.f32.mrb[35].mxu1  ;;  %v967_v19 = vadd.f32 %v3391_v41, %v3365_v58 }
 0x140   : > { %v2108_v61 = vadd.f32 %v2107_v2, %v2106_v63 }
 0x141   : > { %v683_v0 = vadd.f32 %v2020_v59, %v3365_v58  ;;  %v2021_v1 = vpop.f32.mrb[30].mxu0  ;;  %v849_v20 = vmax.f32 %v823_v62, 0.0 }
 0x142   : > { %v2022_v5 = vpop.f32.mrb[31].mxu0  ;;  %v2109_v10 = vpop.f32.mrb[36].mxu1  ;;  %v1012_v52 = vadd.f32 %v2108_v61, %v3365_v58 }
 0x143   : > { %v2023_v7 = vadd.f32 %v2022_v5, %v2021_v1  ;;  %2375 = vmatmul.mubr.f32.gmra.mrb[60].mxu1 %v849_v20  ;;  %v828_v9 = vadd.f32 %v3387_v28, %v683_v0  ;;  %v2110_v16 = vpop.f32.mrb[37].mxu1  ;;  %v977_v28 = vadd.f32 %v3397_v54, %v3365_v58  ;;  %v987_v54 = vadd.f32 %v3405_v18, %v3365_v58 }
 0x144   : > { %v2111_v50 = vadd.f32 %v2110_v16, %v2109_v10 }
 0x145   : > { %v688_v13 = vadd.f32 %v2023_v7, %v3365_v58  ;;  %v2302_v14 = vpop.f32.mrb[32].mxu0  ;;  %v850_v15 = vmax.f32 %v828_v9, 0.0 }
 0x146   : > { %v1117_v17 = vadd.f32 %v2302_v14, %v972_v6  ;;  %v1111_v60 = vpop.f32.mrb[33].mxu0  ;;  %v1017_v5 = vadd.f32 %v2111_v50, %v3365_v58 }
 0x147   : > { %v1112_v23 = vadd.f32 %v1111_v60, %v967_v19  ;;  %2377 = vmatprep.mubr.f32.mxu1 %v850_v15  ;;  %v833_v24 = vadd.f32 %v3385_v27, %v688_v13  ;;  %v2112_v25 = vpop.f32.mrb[38].mxu1 }
 0x148   : > { %v2113_v41 = vpop.f32.mrb[39].mxu1  ;;  %v1191_v29 = vmax.f32 %v1117_v17, 0.0 }
 0x149   : > { %v1190_v26 = vmax.f32 %v1112_v23, 0.0  ;;  %v2305_v21 = vpop.f32.mrb[34].mxu0  ;;  %v851_v4 = vmax.f32 %v833_v24, 0.0  ;;  %v2114_v8 = vadd.f32 %v2113_v41, %v2112_v25 }
 0x14a   : > { %v1127_v31 = vadd.f32 %v2305_v21, %v982_v22  ;;  %v1121_v32 = vpop.f32.mrb[35].mxu0 }
 0x14b   : > { %v1122_v34 = vadd.f32 %v1121_v32, %v977_v28  ;;  %2378 = vmatmul.mubr.f32.gmra.mrb[62].mxu1 %v851_v4  ;;  %2412 = vmatprep.mubr.f32.mxu0 %v1190_v26  ;;  %v2115_v27 = vpop.f32.mrb[40].mxu1  ;;  %v1022_v1 = vadd.f32 %v2114_v8, %v3365_v58  ;;  %v2829_v8 = vmov 0.0|0.0  }
 0x14c   : > { %v1193_v35 = vmax.f32 %v1127_v31, 0.0  ;;  %2413 = vmatmul.mubr.f32.vlgmr.msra.gmra.mrb[48].mxu0 %v1191_v29  ;;  %v2116_v3 = vpop.f32.mrb[41].mxu1  ;;  %2690 = vmatprep.subr.bf16.mxu0 %v2829_v8 }
 0x14d   : > { %v1192_v36 = vmax.f32 %v1122_v34, 0.0  ;;  %v2308_v37 = vpop.f32.mrb[36].mxu0  ;;  %v2117_v43 = vadd.f32 %v2116_v3, %v2115_v27  ;;  %2658 = vmatprep.subr.bf16.mxu1 %v2829_v8  ;;  %v3455_v34 = vld [vmem:[%s3601_s5] ss:$0 sm:$0xff] }
 0x14e   : > { %v1137_v39 = vadd.f32 %v2308_v37, %v992_v33  ;;  %v1131_v40 = vpop.f32.mrb[37].mxu0 }
 0x14f   : > { %2415 = vmatprep.mubr.f32.mxu0 %v1192_v36  ;;  %v1132_v30 = vadd.f32 %v1131_v40, %v987_v54  ;;  %v2118_v12 = vpop.f32.mrb[42].mxu1  ;;  %v1027_v16 = vadd.f32 %v2117_v43, %v3365_v58 }
 0x150   : > { %v1195_v45 = vmax.f32 %v1137_v39, 0.0  ;;  %2416 = vmatmul.mubr.f32.gmra.mrb[50].mxu0 %v1193_v35  ;;  %v2119_v48 = vpop.f32.mrb[43].mxu1 }
 0x151   : > { %v1194_v18 = vmax.f32 %v1132_v30, 0.0  ;;  %v2311_v46 = vpop.f32.mrb[38].mxu0  ;;  %v2120_v53 = vadd.f32 %v2119_v48, %v2118_v12 }
 0x152   : > { %v1147_v49 = vadd.f32 %v2311_v46, %v1002_v42  ;;  %v1141_v51 = vpop.f32.mrb[39].mxu0 }
 0x153   : > { %2418 = vmatprep.mubr.f32.mxu0 %v1194_v18  ;;  %v1142_v55 = vadd.f32 %v1141_v51, %v997_v44  ;;  %v2121_v57 = vpop.f32.mrb[44].mxu1  ;;  %v1032_v14 = vadd.f32 %v2120_v53, %v3365_v58 }
 0x154   : > { %v1197_v56 = vmax.f32 %v1147_v49, 0.0  ;;  %2419 = vmatmul.mubr.f32.gmra.mrb[52].mxu0 %v1195_v45  ;;  %v2122_v62 = vpop.f32.mrb[45].mxu1 }
 0x155   : > { %v1196_v38 = vmax.f32 %v1142_v55, 0.0  ;;  %v2314_v59 = vpop.f32.mrb[40].mxu0  ;;  %v2123_v20 = vadd.f32 %v2122_v62, %v2121_v57 }
 0x156   : > { %v1157_v63 = vadd.f32 %v2314_v59, %v1012_v52  ;;  %v1151_v0 = vpop.f32.mrb[41].mxu0 }
 0x157   : > { %2421 = vmatprep.mubr.f32.mxu0 %v1196_v38  ;;  %v1152_v2 = vadd.f32 %v1151_v0, %v1007_v47  ;;  %v2124_v61 = vpop.f32.mrb[46].mxu1  ;;  %v1037_v25 = vadd.f32 %v2123_v20, %v3365_v58 }
 0x158   : > { %v1199_v6 = vmax.f32 %v1157_v63, 0.0  ;;  %2422 = vmatmul.mubr.f32.gmra.mrb[54].mxu0 %v1197_v56  ;;  %v2125_v9 = vpop.f32.mrb[47].mxu1 }
 0x159   : > { %v1198_v7 = vmax.f32 %v1152_v2, 0.0  ;;  %v2317_v11 = vpop.f32.mrb[42].mxu0  ;;  %v2126_v19 = vadd.f32 %v2125_v9, %v2124_v61 }
 0x15a   : > { %v1167_v10 = vadd.f32 %v2317_v11, %v1022_v1  ;;  %v1161_v13 = vpop.f32.mrb[43].mxu0 }
 0x15b   : > { %2424 = vmatprep.mubr.f32.mxu0 %v1198_v7  ;;  %v1162_v15 = vadd.f32 %v1161_v13, %v1017_v5  ;;  %v1042_v28 = vadd.f32 %v2126_v19, %v3365_v58  ;;  %v2831_v58 = vmov 0.0  }
 0x15c   : > { %v1201_v17 = vmax.f32 %v1167_v10, 0.0  ;;  %2425 = vmatmul.mubr.f32.gmra.mrb[56].mxu0 %v1199_v6  ;;  %2468 = vmatprep.mubr.msk.f32.mxu1 %vm2830_vm2, %v2831_v58 }
 0x15d   : > { %v1200_v60 = vmax.f32 %v1162_v15, 0.0  ;;  %v2320_v22 = vpop.f32.mrb[44].mxu0 }
 0x15e   : > { %v1177_v50 = vadd.f32 %v2320_v22, %v1032_v14  ;;  %v1171_v23 = vpop.f32.mrb[45].mxu0 }
 0x15f   : > { %2427 = vmatprep.mubr.f32.mxu0 %v1200_v60  ;;  %v1172_v24 = vadd.f32 %v1171_v23, %v1027_v16 }
 0x160   : > { %v1203_v26 = vmax.f32 %v1177_v50, 0.0  ;;  %2428 = vmatmul.mubr.f32.gmra.mrb[58].mxu0 %v1201_v17 }
 0x161   : > { %v1202_v21 = vmax.f32 %v1172_v24, 0.0  ;;  %v2323_v4 = vpop.f32.mrb[46].mxu0 }
 0x162   : > { %v1187_v41 = vadd.f32 %v2323_v4, %v1042_v28  ;;  %v1181_v29 = vpop.f32.mrb[47].mxu0 }
 0x163   : > { %2430 = vmatprep.mubr.f32.mxu0 %v1202_v21  ;;  %v1182_v31 = vadd.f32 %v1181_v29, %v1037_v25 }
 0x164   : > { %v1205_v32 = vmax.f32 %v1187_v41, 0.0  ;;  %2431 = vmatmul.mubr.f32.gmra.mrb[60].mxu0 %v1203_v26 }
 0x165   : > { %v1204_v33 = vmax.f32 %v1182_v31, 0.0 }
 0x167   : > { %2433 = vmatprep.mubr.f32.mxu0 %v1204_v33 }
 0x168   : > { %2434 = vmatmul.mubr.f32.gmra.mrb[62].mxu0 %v1205_v32 }
 0x169   : > { %2503 = vmatprep.mubr.msk.f32.mxu0 %vm2830_vm2, %v2831_v58 }
 0x1e6   : > { %v2358_v54 = vpop.f32.mrb[48].mxu1 }
 0x1e7   : > { %v1284_v35 = vadd.f32 %v2358_v54, %v3455_v34  ;;  %v1278_v27 = vpop.f32.mrb[49].mxu1 }
 0x1e8   : > { %v1279_v36 = vadd.f32 %v3455_v34, %v1278_v27 }
 0x1e9   : > { %v1358_v37 = vmax.f32 %v1284_v35, 0.0 }
 0x1ea   : > { %v1357_v3 = vmax.f32 %v1279_v36, 0.0 }
 0x1ec   : > { %v2691_v40 = vpack.c.bf16 %v1358_v37, %v1357_v3 }
 0x1ee   : > { %v2361_v42 = vpop.f32.mrb[50].mxu1  ;;  %2693 = vmatpush3.bf16.xpose.msk.msra.mxu0 %vm3461_vm4, %v2691_v40 }
 0x1ef   : > { %v1294_v43 = vadd.f32 %v2361_v42, %v3455_v34  ;;  %v1288_v30 = vpop.f32.mrb[51].mxu1  ;;  %2694 = vmatprep.subr.bf16.mxu0 %v2829_v8 }
 0x1f0   : > { %v1289_v44 = vadd.f32 %v3455_v34, %v1288_v30 }
 0x1f1   : > { %v1360_v45 = vmax.f32 %v1294_v43, 0.0 }
 0x1f2   : > { %v1359_v12 = vmax.f32 %v1289_v44, 0.0 }
 0x1f4   : > { %v2695_v18 = vpack.c.bf16 %v1360_v45, %v1359_v12 }
 0x1f6   : > { %v2364_v46 = vpop.f32.mrb[52].mxu1  ;;  %2697 = vmatpush3.bf16.xpose.msk.msra.mxu0 %vm3461_vm4, %v2695_v18 }
 0x1f7   : > { %v1304_v48 = vadd.f32 %v2364_v46, %v3455_v34  ;;  %v1298_v49 = vpop.f32.mrb[53].mxu1  ;;  %2698 = vmatprep.subr.bf16.mxu0 %v2829_v8  ;;  %v1534_v46 = vld [vmem:[%s3602_s6] sm:$0x1] }
 0x1f8   : > { %v1299_v51 = vadd.f32 %v3455_v34, %v1298_v49 }
 0x1f9   : > { %v1362_v52 = vmax.f32 %v1304_v48, 0.0 }
 0x1fa   : > { %v1361_v53 = vmax.f32 %v1299_v51, 0.0 }
 0x1fc   : > { %v2699_v55 = vpack.c.bf16 %v1362_v52, %v1361_v53 }
 0x1fe   : > { %v2367_v47 = vpop.f32.mrb[54].mxu1  ;;  %2701 = vmatpush3.bf16.xpose.msk.msra.mxu0 %vm3461_vm4, %v2699_v55 }
 0x1ff   : > { %v1314_v56 = vadd.f32 %v2367_v47, %v3455_v34  ;;  %v1308_v57 = vpop.f32.mrb[55].mxu1  ;;  %2702 = vmatprep.subr.bf16.mxu0 %v2829_v8 }
 0x200   : > { %v1309_v38 = vadd.f32 %v3455_v34, %v1308_v57 }
 0x201   : > { %v1364_v59 = vmax.f32 %v1314_v56, 0.0 }
 0x202   : > { %v1363_v62 = vmax.f32 %v1309_v38, 0.0 }
 0x204   : > { %v2703_v63 = vpack.c.bf16 %v1364_v59, %v1363_v62 }
 0x206   : > { %v2370_v0 = vpop.f32.mrb[56].mxu1  ;;  %2705 = vmatpush3.bf16.xpose.msk.msra.mxu0 %vm3461_vm4, %v2703_v63 }
 0x207   : > { %v1324_v1 = vadd.f32 %v2370_v0, %v3455_v34  ;;  %v1318_v20 = vpop.f32.mrb[57].mxu1  ;;  %2706 = vmatprep.subr.bf16.mxu0 %v2829_v8 }
 0x208   : > { %v1319_v2 = vadd.f32 %v3455_v34, %v1318_v20 }
 0x209   : > { %v1366_v5 = vmax.f32 %v1324_v1, 0.0 }
 0x20a   : > { %v1365_v6 = vmax.f32 %v1319_v2, 0.0 }
 0x20c   : > { %v2707_v61 = vpack.c.bf16 %v1366_v5, %v1365_v6 }
 0x20e   : > { %v2373_v7 = vpop.f32.mrb[58].mxu1  ;;  %2709 = vmatpush3.bf16.xpose.msk.msra.mxu0 %vm3461_vm4, %v2707_v61 }
 0x20f   : > { %v1334_v11 = vadd.f32 %v2373_v7, %v3455_v34  ;;  %v1328_v9 = vpop.f32.mrb[59].mxu1  ;;  %2710 = vmatprep.subr.bf16.mxu0 %v2829_v8 }
 0x210   : > { %v1329_v10 = vadd.f32 %v3455_v34, %v1328_v9 }
 0x211   : > { %v1368_v13 = vmax.f32 %v1334_v11, 0.0 }
 0x212   : > { %v1367_v14 = vmax.f32 %v1329_v10, 0.0 }
 0x214   : > { %v2711_v19 = vpack.c.bf16 %v1368_v13, %v1367_v14 }
 0x216   : > { %v2376_v15 = vpop.f32.mrb[60].mxu1  ;;  %2713 = vmatpush3.bf16.xpose.msk.msra.mxu0 %vm3461_vm4, %v2711_v19 }
 0x217   : > { %v1344_v16 = vadd.f32 %v2376_v15, %v3455_v34  ;;  %v1338_v17 = vpop.f32.mrb[61].mxu1  ;;  %2714 = vmatprep.subr.bf16.mxu0 %v2829_v8 }
 0x218   : > { %v1339_v60 = vadd.f32 %v3455_v34, %v1338_v17 }
 0x219   : > { %v1370_v22 = vmax.f32 %v1344_v16, 0.0 }
 0x21a   : > { %v1369_v50 = vmax.f32 %v1339_v60, 0.0 }
 0x21c   : > { %v2715_v23 = vpack.c.bf16 %v1370_v22, %v1369_v50 }
 0x21e   : > { %v2379_v28 = vpop.f32.mrb[62].mxu1  ;;  %2717 = vmatpush3.bf16.xpose.msk.msra.mxu0 %vm3461_vm4, %v2715_v23 }
 0x21f   : > { %v1354_v24 = vadd.f32 %v2379_v28, %v3455_v34  ;;  %v1348_v25 = vpop.f32.mrb[63].mxu1  ;;  %v2414_v26 = vpop.f32.mrb[48].mxu0  ;;  %2718 = vmatprep.subr.bf16.mxu0 %v2829_v8 }
 0x220   : > { %v1349_v21 = vadd.f32 %v3455_v34, %v1348_v25  ;;  %v1445_v4 = vadd.f32 %v2414_v26, %v3455_v34  ;;  %v1439_v41 = vpop.f32.mrb[49].mxu0 }
 0x221   : > { %v1372_v29 = vmax.f32 %v1354_v24, 0.0  ;;  %v1440_v31 = vadd.f32 %v3455_v34, %v1439_v41  ;;  %v1780_v41 = vstv %s1779_s19 }
 0x222   : > { %v1371_v32 = vmax.f32 %v1349_v21, 0.0  ;;  %v1519_v33 = vmax.f32 %v1445_v4, 0.0 }
 0x223   : > { %v1518_v58 = vmax.f32 %v1440_v31, 0.0  ;;  %v2417_v54 = vpop.f32.mrb[50].mxu0 }
 0x224   : > { %v2719_v35 = vpack.c.bf16 %v1372_v29, %v1371_v32  ;;  %v1455_v27 = vadd.f32 %v2417_v54, %v3455_v34  ;;  %v1449_v36 = vpop.f32.mrb[51].mxu0 }
 0x225   : > { %v2659_v37 = vpack.c.bf16 %v1519_v33, %v1518_v58  ;;  %v1450_v3 = vadd.f32 %v3455_v34, %v1449_v36 }
 0x226   : > { %v1521_v40 = vmax.f32 %v1455_v27, 0.0  ;;  %2721 = vmatpush3.bf16.xpose.msk.msra.mxu0 %vm3461_vm4, %v2719_v35 }
 0x227   : > { %v1520_v42 = vmax.f32 %v1450_v3, 0.0  ;;  %2661 = vmatpush3.bf16.xpose.msk.msra.mxu1 %vm3461_vm4, %v2659_v37  ;;  %v2420_v43 = vpop.f32.mrb[52].mxu0 }
 0x228   : > { %v1465_v30 = vadd.f32 %v2420_v43, %v3455_v34  ;;  %v1459_v44 = vpop.f32.mrb[53].mxu0  ;;  %2662 = vmatprep.subr.bf16.mxu1 %v2829_v8 }
 0x229   : > { %v2663_v45 = vpack.c.bf16 %v1521_v40, %v1520_v42  ;;  %v1460_v12 = vadd.f32 %v3455_v34, %v1459_v44 }
 0x22a   : > { %v1523_v18 = vmax.f32 %v1465_v30, 0.0 }
 0x22b   : > { %v1522_v48 = vmax.f32 %v1460_v12, 0.0  ;;  %v2423_v49 = vpop.f32.mrb[54].mxu0 }
 0x22c   : > { %v1475_v51 = vadd.f32 %v2423_v49, %v3455_v34  ;;  %v1469_v52 = vpop.f32.mrb[55].mxu0 }
 0x22d   : > { %v2667_v53 = vpack.c.bf16 %v1523_v18, %v1522_v48  ;;  %v1470_v55 = vadd.f32 %v3455_v34, %v1469_v52  ;;  %2504 = vmatmul.mubr.msk.f32.vlgmr.msra.gmra.mrb[64].mxu0 %vm1536_vm3, %v1534_v46 }
 0x22e   : > { %v1525_v47 = vmax.f32 %v1475_v51, 0.0 }
 0x22f   : > { %2665 = vmatpush3.bf16.xpose.msk.msra.mxu1 %vm3461_vm4, %v2663_v45  ;;  %v1524_v56 = vmax.f32 %v1470_v55, 0.0  ;;  %v2426_v57 = vpop.f32.mrb[56].mxu0 }
 0x230   : > { %2666 = vmatprep.subr.bf16.mxu1 %v2829_v8  ;;  %v1485_v38 = vadd.f32 %v2426_v57, %v3455_v34  ;;  %v1479_v59 = vpop.f32.mrb[57].mxu0 }
 0x231   : > { %v2671_v62 = vpack.c.bf16 %v1525_v47, %v1524_v56  ;;  %v1480_v63 = vadd.f32 %v3455_v34, %v1479_v59 }
 0x232   : > { %v1527_v0 = vmax.f32 %v1485_v38, 0.0 }
 0x233   : > { %v1526_v1 = vmax.f32 %v1480_v63, 0.0  ;;  %v2429_v20 = vpop.f32.mrb[58].mxu0 }
 0x234   : > { %v1495_v2 = vadd.f32 %v2429_v20, %v3455_v34  ;;  %v1489_v5 = vpop.f32.mrb[59].mxu0 }
 0x235   : > { %v2675_v6 = vpack.c.bf16 %v1527_v0, %v1526_v1  ;;  %v1490_v61 = vadd.f32 %v3455_v34, %v1489_v5 }
 0x236   : > { %v1529_v7 = vmax.f32 %v1495_v2, 0.0 }
 0x237   : > { %2669 = vmatpush3.bf16.xpose.msk.msra.mxu1 %vm3461_vm4, %v2667_v53  ;;  %v1528_v11 = vmax.f32 %v1490_v61, 0.0  ;;  %v2432_v9 = vpop.f32.mrb[60].mxu0 }
 0x238   : > { %2670 = vmatprep.subr.bf16.mxu1 %v2829_v8  ;;  %v1505_v10 = vadd.f32 %v2432_v9, %v3455_v34  ;;  %v1499_v13 = vpop.f32.mrb[61].mxu0 }
 0x239   : > { %v2679_v14 = vpack.c.bf16 %v1529_v7, %v1528_v11  ;;  %v1500_v19 = vadd.f32 %v3455_v34, %v1499_v13 }
 0x23a   : > { %v1531_v15 = vmax.f32 %v1505_v10, 0.0 }
 0x23b   : > { %v1530_v16 = vmax.f32 %v1500_v19, 0.0  ;;  %v2435_v17 = vpop.f32.mrb[62].mxu0 }
 0x23c   : > { %v1515_v60 = vadd.f32 %v2435_v17, %v3455_v34  ;;  %v1509_v22 = vpop.f32.mrb[63].mxu0 }
 0x23d   : > { %v2683_v50 = vpack.c.bf16 %v1531_v15, %v1530_v16  ;;  %v1510_v23 = vadd.f32 %v3455_v34, %v1509_v22  ;;  %v1535_v34 = vld [vmem:[%s3602_s6 + $0x1] sm:$0x1] }
 0x23e   : > { %v1533_v28 = vmax.f32 %v1515_v60, 0.0 }
 0x23f   : > { %2673 = vmatpush3.bf16.xpose.msk.msra.mxu1 %vm3461_vm4, %v2671_v62  ;;  %v1532_v24 = vmax.f32 %v1510_v23, 0.0 }
 0x240   : > { %2674 = vmatprep.subr.bf16.mxu1 %v2829_v8 }
 0x241   : > { %v2687_v25 = vpack.c.bf16 %v1533_v28, %v1532_v24 }
 0x247   : > { %2677 = vmatpush3.bf16.xpose.msk.msra.mxu1 %vm3461_vm4, %v2675_v6 }
 0x248   : > { %2678 = vmatprep.subr.bf16.mxu1 %v2829_v8 }
 0x24f   : > { %2681 = vmatpush3.bf16.xpose.msk.msra.mxu1 %vm3461_vm4, %v2679_v14 }
 0x250   : > { %2682 = vmatprep.subr.bf16.mxu1 %v2829_v8 }
 0x257   : > { %2685 = vmatpush3.bf16.xpose.msk.msra.mxu1 %vm3461_vm4, %v2683_v50 }
 0x258   : > { %2686 = vmatprep.subr.bf16.mxu1 %v2829_v8 }
 0x25f   : > { %2689 = vmatpush3.bf16.xpose.msk.msra.mxu1 %vm3461_vm4, %v2687_v25 }
 0x266   : > { %2469 = vmatmul.mubr.msk.f32.vlgmr.msra.gmra.mrb[64].mxu1 %vm1536_vm3, %v1535_v34 }
 0x300   : > { %v1775_v26 = vpop.f32.mrb[64].mxu0 }
 0x301   : > { %v2505_v21 = vpop.f32.mrb[65].mxu0 }
 0x339   : > { %v1654_v4 = vpop.f32.mrb[64].mxu1 }
 0x33a   : > { %v1776_v29 = vadd.f32 %v1775_v26, %v1654_v4  ;;  %v2470_v8 = vpop.f32.mrb[65].mxu1 }
 0x33c   : > { %v1781_v31 = vadd.f32 %v1780_v41, %v1776_v29 }
 0x33e   : > { %1782 = vst [vmem:[%s319_s22] sm:$0x1] %v1781_v31 }
 0x33f   : > { %2778 = shalt.err (!%p2775_p3)
}
 0x340   : > { %s2779_s24 = scalar_lea.hbm %s3554_s23, 16  ;;  %s2783_s19 = scalar_lea.hbm %s3604_s8, 32 }
 0x341   : > { %p2780_p4 = scmp.ne.s32.totalorder %s3554_s23, %s2779_s24  ;;  %p2784_p9 = scmp.lt.u32.totalorder %s3554_s23, %s3604_s8 }
 0x342   : > { %p2785_p10 = scmp.lt.u32.totalorder %s2783_s19, %s2779_s24  ;;  %p2787_p12 = scmp.lt.u32.totalorder %s2779_s24, %s3554_s23 }
 0x343   : > { %p2781_p7 = pnand %p2780_p4, %p2916_p5 }
 0x344   : > { %p2786_p11 = por %p2785_p10, %p2784_p9 }
 0x345   : > { %p2782_p8 = pneg %p2781_p7 }
 0x346   : > { %p2788_p13 = por %p2787_p12, %p2786_p11 }
 0x348   : > { %p2789_p0 = pnand %p2788_p13, %p2782_p8 }
 0x34a   : > { %2792 = shalt.err (!%p2789_p0)
}
 0x34b   : > { %2723 = dma.vmem_to_hbm [thread:$0]  (%p2916_p5), %s3556_s25, 16, %s3554_s23, %s1784_s27  }
 0x34c PF: > { %p2729_p1 = scmp.ge.s32.totalorder %s2827_s10, 2  ;;  %s1808_s13 = sand.u32 1, %s2815_s29  }
 0x34d   : > { %s1809_s26 = scalar_lea.sflag [#allocation4], %s1808_s13 }
 0x34e   : > { %p2726_p2 = pnand %p2729_p1, %p2920_p6 }
 0x350   : > { %2810 = dma.done.wait (!%p2726_p2), %s1809_s26, 16  }
 0x351   : > { %2812 = vsyncadd (!%p2726_p2), %s1809_s26, 4294967280  ;;  %p19_p3 = scmp.ge.s32.totalorder %s2904_s12, 4   ;;  %s3609_s29 = smov %s2819_s30 }
 0x352   : > { %s3610_s30 = smov %s2823_s9  ;;  %s3611_s9 = smov %s2914_s15 }
 0x353   : > { %s3612_s10 = smov %s2904_s12  ;;  %21 = sbr.rel (!%p19_p3) target bundleno = 5 (0x5), region = 90 }
 0x35a   :  { %1813 = vsyncpa [#allocation4], 1 }
 0x35b   :  { %1815 = vsyncpa [#allocation4 + $0x1], 1 }

</bundles_post_ra>
